<compile_context>
chip_gen: v7x
topology: tpu7x:2x2x1
jax: 0.10.0
libtpu: 0.0.40
codegen_flags: <defaults>
</compile_context>

<pallas_src>
import jax
import jax.numpy as jnp
from jax import lax
from jax.experimental import pallas as pl
from jax.experimental.pallas import tpu as pltpu

HIDDEN_DIM = 50  # must equal hidden_size (the torch module's init hidden uses it)


def lstm_kernel(x_ref, h0_ref, c0_ref, wih_ref, whh_ref, b_ref, wout_ref, bout_ref,
                out_ref, hs_ref):
    """Whole sequence in one invocation. Gate g occupies lanes [g*Hp, (g+1)*Hp)."""
    Bp, Hp = h0_ref.shape            # (8, 128)
    S = x_ref.shape[0] // Bp         # 8

    # Hoisted input projection for ALL time steps (not on the serial path):
    # (S*Bp, Ip) @ (Ip, 4*Hp) + (b_ih + b_hh), padded lanes stay exactly 0.
    xw = (jnp.dot(x_ref[...], wih_ref[...], preferred_element_type=jnp.float32)
          + b_ref[...])

    whh = whh_ref[...]               # (Hp, 4*Hp), padded rows/cols are zero
    h = h0_ref[...]                  # (Bp, Hp)
    c = c0_ref[...]                  # (Bp, Hp)

    # Static, fully-unrolled time loop: only h @ W_hh remains per step.
    for t in range(S):
        gates = xw[t * Bp:(t + 1) * Bp, :] + jnp.dot(
            h, whh, preferred_element_type=jnp.float32)        # (Bp, 4*Hp)
        # PyTorch gate order [i, f, g, o]; each slice is an exact 128-lane tile.
        i_g = jax.nn.sigmoid(gates[:, 0 * Hp:1 * Hp])
        f_g = jax.nn.sigmoid(gates[:, 1 * Hp:2 * Hp])
        g_g = jnp.tanh(gates[:, 2 * Hp:3 * Hp])
        o_g = jax.nn.sigmoid(gates[:, 3 * Hp:4 * Hp])
        c = f_g * c + i_g * g_g
        h = o_g * jnp.tanh(c)
        hs_ref[t * Bp:(t + 1) * Bp, :] = h                      # sublane-aligned store

    # Hoisted output projection: one lane-dense matmul + bias, single unmasked store.
    out_ref[...] = (jnp.dot(hs_ref[...], wout_ref[...],
                            preferred_element_type=jnp.float32) + bout_ref[...])


def lstm_linear_forward(x, h0, c0, w_ih, w_hh, b_ih, b_hh, w_out, b_out):
    """x: (S, B, I); h0/c0: (B, H); weights pre-transposed:
    w_ih: (I, 4H), w_hh: (H, 4H), w_out: (H, O); biases (1, 4H)/(1, O).
    Returns (S, B, O) f32, matching nn.Linear(nn.LSTM(x, (h0, c0))[0])."""
    S, B, I = x.shape
    H = h0.shape[-1]
    O = w_out.shape[-1]

    Bp = 8     # pad batch to a full sublane
    Hp = 128   # pad each gate's hidden dim to a full lane tile
    Ip = 128   # pad input features to a full lane tile
    Op = 128   # pad output features to a full lane tile (lane-dense store)
    f32 = jnp.float32

    def pack_gates(w, rows, rows_pad):
        """(rows, 4*H) gate-major -> (rows_pad, 4*Hp), gate g at lanes [g*Hp, g*Hp+H)."""
        wp = jnp.zeros((rows_pad, 4 * Hp), f32)
        for g in range(4):
            wp = wp.at[:rows, g * Hp:g * Hp + H].set(w[:, g * H:(g + 1) * H])
        return wp

    w_ih_p = pack_gates(w_ih.astype(f32), I, Ip)                     # (Ip, 4*Hp)
    w_hh_p = pack_gates(w_hh.astype(f32), H, Hp)                     # (Hp, 4*Hp)
    b_p = pack_gates((b_ih + b_hh).reshape(1, 4 * H).astype(f32), 1, 1)  # (1, 4*Hp)

    w_out_p = jnp.zeros((Hp, Op), f32).at[:H, :O].set(w_out.astype(f32))
    b_out_p = jnp.zeros((1, Op), f32).at[:, :O].set(b_out.reshape(1, O).astype(f32))

    h0_p = jnp.zeros((Bp, Hp), f32).at[:B, :H].set(h0.astype(f32))
    c0_p = jnp.zeros((Bp, Hp), f32).at[:B, :H].set(c0.astype(f32))

    x_p = (jnp.zeros((S, Bp, Ip), f32).at[:, :B, :I].set(x.astype(f32))
           .reshape(S * Bp, Ip))

    vmem = pl.BlockSpec(memory_space=pltpu.MemorySpace.VMEM)
    out_p = pl.pallas_call(
        lstm_kernel,
        out_shape=jax.ShapeDtypeStruct((S * Bp, Op), f32),
        in_specs=[vmem] * 8,
        out_specs=vmem,
        scratch_shapes=[pltpu.VMEM((S * Bp, Hp), f32)],   # h_t history for fused out-proj
    )(x_p, h0_p, c0_p, w_ih_p, w_hh_p, b_p, w_out_p, b_out_p)

    return out_p.reshape(S, Bp, Op)[:, :B, :O]


def reference_forward(x, h0, c0, w_ih, w_hh, b_ih, b_hh, w_out, b_out):
    """Pure-JAX reference replicating torch.nn.LSTM + nn.Linear semantics."""
    H = h0.shape[-1]

    def step(carry, x_t):
        h, c = carry
        gates = x_t @ w_ih + h @ w_hh + b_ih + b_hh
        i = jax.nn.sigmoid(gates[:, 0 * H:1 * H])
        f = jax.nn.sigmoid(gates[:, 1 * H:2 * H])
        g = jnp.tanh(gates[:, 2 * H:3 * H])
        o = jax.nn.sigmoid(gates[:, 3 * H:4 * H])
        c_new = f * c + i * g
        h_new = o * jnp.tanh(c_new)
        return (h_new, c_new), h_new

    _, hs = lax.scan(step, (h0, c0), x)
    return hs @ w_out + b_out


if __name__ == "__main__":
    input_size = 16
    hidden_size = HIDDEN_DIM      # 50
    output_size = 8
    batch_size = 2
    seq_len = 8

    key = jax.random.PRNGKey(0)
    ks = jax.random.split(key, 10)

    stdv = 1.0 / jnp.sqrt(hidden_size)
    # LSTM params (PyTorch layout weight_ih_l0 (4H, I), weight_hh_l0 (4H, H)),
    # stored transposed for the kernel. Gate order: i, f, g, o.
    w_ih = jax.random.uniform(ks[0], (input_size, 4 * hidden_size),
                              minval=-stdv, maxval=stdv, dtype=jnp.float32)
    w_hh = jax.random.uniform(ks[1], (hidden_size, 4 * hidden_size),
                              minval=-stdv, maxval=stdv, dtype=jnp.float32)
    b_ih = jax.random.uniform(ks[2], (1, 4 * hidden_size),
                              minval=-stdv, maxval=stdv, dtype=jnp.float32)
    b_hh = jax.random.uniform(ks[3], (1, 4 * hidden_size),
                              minval=-stdv, maxval=stdv, dtype=jnp.float32)
    # Linear params (weight (O, H) in torch) stored transposed.
    stdv_l = 1.0 / jnp.sqrt(hidden_size)
    w_out = jax.random.uniform(ks[4], (hidden_size, output_size),
                               minval=-stdv_l, maxval=stdv_l, dtype=jnp.float32)
    b_out = jax.random.uniform(ks[5], (1, output_size),
                               minval=-stdv_l, maxval=stdv_l, dtype=jnp.float32)

    # self.hidden = (rand(levels, B, HIDDEN_DIM), rand(levels, B, HIDDEN_DIM)); levels=1 squeezed.
    h0 = jax.random.uniform(ks[6], (batch_size, hidden_size), dtype=jnp.float32)
    c0 = jax.random.uniform(ks[7], (batch_size, hidden_size), dtype=jnp.float32)

    # Input: (seq, batch, input_size), PyTorch default time-major layout.
    x = jax.random.normal(ks[8], (seq_len, batch_size, input_size), dtype=jnp.float32)

    out = lstm_linear_forward(x, h0, c0, w_ih, w_hh, b_ih, b_hh, w_out, b_out)
    out = jax.block_until_ready(out)

    ref = reference_forward(x, h0, c0, w_ih=w_ih, w_hh=w_hh, b_ih=b_ih, b_hh=b_hh,
                            w_out=w_out, b_out=b_out)
    assert out.shape == (seq_len, batch_size, output_size)
    assert jnp.allclose(out, ref, atol=1e-5, rtol=1e-5), "mismatch vs reference"

    print("KERNEL_OK")
</pallas_src>

<mosaic_0001>
module attributes {stable_mosaic.version = 11 : i64} {
  func.func @lstm_kernel(%arg0: memref<64x128xf32, #tpu.memory_space<vmem>>, %arg1: memref<8x128xf32, #tpu.memory_space<vmem>>, %arg2: memref<8x128xf32, #tpu.memory_space<vmem>>, %arg3: memref<128x512xf32, #tpu.memory_space<vmem>>, %arg4: memref<128x512xf32, #tpu.memory_space<vmem>>, %arg5: memref<1x512xf32, #tpu.memory_space<vmem>>, %arg6: memref<128x128xf32, #tpu.memory_space<vmem>>, %arg7: memref<1x128xf32, #tpu.memory_space<vmem>>, %arg8: memref<64x128xf32, #tpu.memory_space<vmem>>, %arg9: memref<64x128xf32, #tpu.memory_space<vmem>>) attributes {dimension_semantics = [], scalar_prefetch = 0 : i64, scratch_operands = 1 : i64, tpu.core_type = #tpu.core_type<tc>} {
    %c0 = arith.constant 0 : index
    %c0_0 = arith.constant 0 : index
    %0 = vector.load %arg0[%c0, %c0_0] : memref<64x128xf32, #tpu.memory_space<vmem>>, vector<64x128xf32>
    %c0_1 = arith.constant 0 : index
    %c0_2 = arith.constant 0 : index
    %1 = vector.load %arg3[%c0_1, %c0_2] : memref<128x512xf32, #tpu.memory_space<vmem>>, vector<128x512xf32>
    %cst = arith.constant dense<0.000000e+00> : vector<64x512xf32>
    %2 = tpu.matmul %0, %1, %cst {dimension_numbers = #tpu.dot_dimension_numbers<[1], [0], [0], [1], [0, 0, 1, 1], [], []>} : vector<64x128xf32>, vector<128x512xf32>, vector<64x512xf32> -> vector<64x512xf32>
    %c0_3 = arith.constant 0 : index
    %c0_4 = arith.constant 0 : index
    %3 = vector.load %arg5[%c0_3, %c0_4] : memref<1x512xf32, #tpu.memory_space<vmem>>, vector<1x512xf32>
    %4 = vector.broadcast %3 : vector<1x512xf32> to vector<64x512xf32>
    %5 = arith.addf %2, %4 : vector<64x512xf32>
    %c0_5 = arith.constant 0 : index
    %c0_6 = arith.constant 0 : index
    %6 = vector.load %arg4[%c0_5, %c0_6] : memref<128x512xf32, #tpu.memory_space<vmem>>, vector<128x512xf32>
    %c0_7 = arith.constant 0 : index
    %c0_8 = arith.constant 0 : index
    %7 = vector.load %arg1[%c0_7, %c0_8] : memref<8x128xf32, #tpu.memory_space<vmem>>, vector<8x128xf32>
    %c0_9 = arith.constant 0 : index
    %c0_10 = arith.constant 0 : index
    %8 = vector.load %arg2[%c0_9, %c0_10] : memref<8x128xf32, #tpu.memory_space<vmem>>, vector<8x128xf32>
    %9 = vector.extract_strided_slice %5 {offsets = [0, 0], sizes = [8, 512], strides = [1, 1]} : vector<64x512xf32> to vector<8x512xf32>
    %cst_11 = arith.constant dense<0.000000e+00> : vector<8x512xf32>
    %10 = tpu.matmul %7, %6, %cst_11 {dimension_numbers = #tpu.dot_dimension_numbers<[1], [0], [0], [1], [0, 0, 1, 1], [], []>} : vector<8x128xf32>, vector<128x512xf32>, vector<8x512xf32> -> vector<8x512xf32>
    %11 = arith.addf %9, %10 : vector<8x512xf32>
    %12 = vector.extract_strided_slice %11 {offsets = [0, 0], sizes = [8, 128], strides = [1, 1]} : vector<8x512xf32> to vector<8x128xf32>
    %13 = arith.negf %12 : vector<8x128xf32>
    %14 = math.exp %13 : vector<8x128xf32>
    %cst_12 = arith.constant 1.000000e+00 : f32
    %15 = vector.broadcast %cst_12 : f32 to vector<8x128xf32>
    %16 = arith.addf %15, %14 : vector<8x128xf32>
    %17 = arith.divf %15, %16 : vector<8x128xf32>
    %18 = vector.extract_strided_slice %11 {offsets = [0, 128], sizes = [8, 128], strides = [1, 1]} : vector<8x512xf32> to vector<8x128xf32>
    %19 = arith.negf %18 : vector<8x128xf32>
    %20 = math.exp %19 : vector<8x128xf32>
    %cst_13 = arith.constant 1.000000e+00 : f32
    %21 = vector.broadcast %cst_13 : f32 to vector<8x128xf32>
    %22 = arith.addf %21, %20 : vector<8x128xf32>
    %23 = arith.divf %21, %22 : vector<8x128xf32>
    %24 = vector.extract_strided_slice %11 {offsets = [0, 256], sizes = [8, 128], strides = [1, 1]} : vector<8x512xf32> to vector<8x128xf32>
    %25 = math.tanh %24 : vector<8x128xf32>
    %26 = vector.extract_strided_slice %11 {offsets = [0, 384], sizes = [8, 128], strides = [1, 1]} : vector<8x512xf32> to vector<8x128xf32>
    %27 = arith.negf %26 : vector<8x128xf32>
    %28 = math.exp %27 : vector<8x128xf32>
    %cst_14 = arith.constant 1.000000e+00 : f32
    %29 = vector.broadcast %cst_14 : f32 to vector<8x128xf32>
    %30 = arith.addf %29, %28 : vector<8x128xf32>
    %31 = arith.divf %29, %30 : vector<8x128xf32>
    %32 = arith.mulf %23, %8 : vector<8x128xf32>
    %33 = arith.mulf %17, %25 : vector<8x128xf32>
    %34 = arith.addf %32, %33 : vector<8x128xf32>
    %35 = math.tanh %34 : vector<8x128xf32>
    %36 = arith.mulf %31, %35 : vector<8x128xf32>
    %c0_15 = arith.constant 0 : index
    %c0_16 = arith.constant 0 : index
    %37 = vector.load %arg9[%c0_15, %c0_16] : memref<64x128xf32, #tpu.memory_space<vmem>>, vector<8x128xf32>
    tpu.vector_store %arg9[%c0_15, %c0_16], %36 {strides = array<i32>} : memref<64x128xf32, #tpu.memory_space<vmem>>, vector<8x128xf32>,
    %38 = vector.extract_strided_slice %5 {offsets = [8, 0], sizes = [8, 512], strides = [1, 1]} : vector<64x512xf32> to vector<8x512xf32>
    %cst_17 = arith.constant dense<0.000000e+00> : vector<8x512xf32>
    %39 = tpu.matmul %36, %6, %cst_17 {dimension_numbers = #tpu.dot_dimension_numbers<[1], [0], [0], [1], [0, 0, 1, 1], [], []>} : vector<8x128xf32>, vector<128x512xf32>, vector<8x512xf32> -> vector<8x512xf32>
    %40 = arith.addf %38, %39 : vector<8x512xf32>
    %41 = vector.extract_strided_slice %40 {offsets = [0, 0], sizes = [8, 128], strides = [1, 1]} : vector<8x512xf32> to vector<8x128xf32>
    %42 = arith.negf %41 : vector<8x128xf32>
    %43 = math.exp %42 : vector<8x128xf32>
    %cst_18 = arith.constant 1.000000e+00 : f32
    %44 = vector.broadcast %cst_18 : f32 to vector<8x128xf32>
    %45 = arith.addf %44, %43 : vector<8x128xf32>
    %46 = arith.divf %44, %45 : vector<8x128xf32>
    %47 = vector.extract_strided_slice %40 {offsets = [0, 128], sizes = [8, 128], strides = [1, 1]} : vector<8x512xf32> to vector<8x128xf32>
    %48 = arith.negf %47 : vector<8x128xf32>
    %49 = math.exp %48 : vector<8x128xf32>
    %cst_19 = arith.constant 1.000000e+00 : f32
    %50 = vector.broadcast %cst_19 : f32 to vector<8x128xf32>
    %51 = arith.addf %50, %49 : vector<8x128xf32>
    %52 = arith.divf %50, %51 : vector<8x128xf32>
    %53 = vector.extract_strided_slice %40 {offsets = [0, 256], sizes = [8, 128], strides = [1, 1]} : vector<8x512xf32> to vector<8x128xf32>
    %54 = math.tanh %53 : vector<8x128xf32>
    %55 = vector.extract_strided_slice %40 {offsets = [0, 384], sizes = [8, 128], strides = [1, 1]} : vector<8x512xf32> to vector<8x128xf32>
    %56 = arith.negf %55 : vector<8x128xf32>
    %57 = math.exp %56 : vector<8x128xf32>
    %cst_20 = arith.constant 1.000000e+00 : f32
    %58 = vector.broadcast %cst_20 : f32 to vector<8x128xf32>
    %59 = arith.addf %58, %57 : vector<8x128xf32>
    %60 = arith.divf %58, %59 : vector<8x128xf32>
    %61 = arith.mulf %52, %34 : vector<8x128xf32>
    %62 = arith.mulf %46, %54 : vector<8x128xf32>
    %63 = arith.addf %61, %62 : vector<8x128xf32>
    %64 = math.tanh %63 : vector<8x128xf32>
    %65 = arith.mulf %60, %64 : vector<8x128xf32>
    %c8 = arith.constant 8 : index
    %c0_21 = arith.constant 0 : index
    %66 = vector.load %arg9[%c8, %c0_21] : memref<64x128xf32, #tpu.memory_space<vmem>>, vector<8x128xf32>
    tpu.vector_store %arg9[%c8, %c0_21], %65 {strides = array<i32>} : memref<64x128xf32, #tpu.memory_space<vmem>>, vector<8x128xf32>,
    %67 = vector.extract_strided_slice %5 {offsets = [16, 0], sizes = [8, 512], strides = [1, 1]} : vector<64x512xf32> to vector<8x512xf32>
    %cst_22 = arith.constant dense<0.000000e+00> : vector<8x512xf32>
    %68 = tpu.matmul %65, %6, %cst_22 {dimension_numbers = #tpu.dot_dimension_numbers<[1], [0], [0], [1], [0, 0, 1, 1], [], []>} : vector<8x128xf32>, vector<128x512xf32>, vector<8x512xf32> -> vector<8x512xf32>
    %69 = arith.addf %67, %68 : vector<8x512xf32>
    %70 = vector.extract_strided_slice %69 {offsets = [0, 0], sizes = [8, 128], strides = [1, 1]} : vector<8x512xf32> to vector<8x128xf32>
    %71 = arith.negf %70 : vector<8x128xf32>
    %72 = math.exp %71 : vector<8x128xf32>
    %cst_23 = arith.constant 1.000000e+00 : f32
    %73 = vector.broadcast %cst_23 : f32 to vector<8x128xf32>
    %74 = arith.addf %73, %72 : vector<8x128xf32>
    %75 = arith.divf %73, %74 : vector<8x128xf32>
    %76 = vector.extract_strided_slice %69 {offsets = [0, 128], sizes = [8, 128], strides = [1, 1]} : vector<8x512xf32> to vector<8x128xf32>
    %77 = arith.negf %76 : vector<8x128xf32>
    %78 = math.exp %77 : vector<8x128xf32>
    %cst_24 = arith.constant 1.000000e+00 : f32
    %79 = vector.broadcast %cst_24 : f32 to vector<8x128xf32>
    %80 = arith.addf %79, %78 : vector<8x128xf32>
    %81 = arith.divf %79, %80 : vector<8x128xf32>
    %82 = vector.extract_strided_slice %69 {offsets = [0, 256], sizes = [8, 128], strides = [1, 1]} : vector<8x512xf32> to vector<8x128xf32>
    %83 = math.tanh %82 : vector<8x128xf32>
    %84 = vector.extract_strided_slice %69 {offsets = [0, 384], sizes = [8, 128], strides = [1, 1]} : vector<8x512xf32> to vector<8x128xf32>
    %85 = arith.negf %84 : vector<8x128xf32>
    %86 = math.exp %85 : vector<8x128xf32>
    %cst_25 = arith.constant 1.000000e+00 : f32
    %87 = vector.broadcast %cst_25 : f32 to vector<8x128xf32>
    %88 = arith.addf %87, %86 : vector<8x128xf32>
    %89 = arith.divf %87, %88 : vector<8x128xf32>
    %90 = arith.mulf %81, %63 : vector<8x128xf32>
    %91 = arith.mulf %75, %83 : vector<8x128xf32>
    %92 = arith.addf %90, %91 : vector<8x128xf32>
    %93 = math.tanh %92 : vector<8x128xf32>
    %94 = arith.mulf %89, %93 : vector<8x128xf32>
    %c16 = arith.constant 16 : index
    %c0_26 = arith.constant 0 : index
    %95 = vector.load %arg9[%c16, %c0_26] : memref<64x128xf32, #tpu.memory_space<vmem>>, vector<8x128xf32>
    tpu.vector_store %arg9[%c16, %c0_26], %94 {strides = array<i32>} : memref<64x128xf32, #tpu.memory_space<vmem>>, vector<8x128xf32>,
    %96 = vector.extract_strided_slice %5 {offsets = [24, 0], sizes = [8, 512], strides = [1, 1]} : vector<64x512xf32> to vector<8x512xf32>
    %cst_27 = arith.constant dense<0.000000e+00> : vector<8x512xf32>
    %97 = tpu.matmul %94, %6, %cst_27 {dimension_numbers = #tpu.dot_dimension_numbers<[1], [0], [0], [1], [0, 0, 1, 1], [], []>} : vector<8x128xf32>, vector<128x512xf32>, vector<8x512xf32> -> vector<8x512xf32>
    %98 = arith.addf %96, %97 : vector<8x512xf32>
    %99 = vector.extract_strided_slice %98 {offsets = [0, 0], sizes = [8, 128], strides = [1, 1]} : vector<8x512xf32> to vector<8x128xf32>
    %100 = arith.negf %99 : vector<8x128xf32>
    %101 = math.exp %100 : vector<8x128xf32>
    %cst_28 = arith.constant 1.000000e+00 : f32
    %102 = vector.broadcast %cst_28 : f32 to vector<8x128xf32>
    %103 = arith.addf %102, %101 : vector<8x128xf32>
    %104 = arith.divf %102, %103 : vector<8x128xf32>
    %105 = vector.extract_strided_slice %98 {offsets = [0, 128], sizes = [8, 128], strides = [1, 1]} : vector<8x512xf32> to vector<8x128xf32>
    %106 = arith.negf %105 : vector<8x128xf32>
    %107 = math.exp %106 : vector<8x128xf32>
    %cst_29 = arith.constant 1.000000e+00 : f32
    %108 = vector.broadcast %cst_29 : f32 to vector<8x128xf32>
    %109 = arith.addf %108, %107 : vector<8x128xf32>
    %110 = arith.divf %108, %109 : vector<8x128xf32>
    %111 = vector.extract_strided_slice %98 {offsets = [0, 256], sizes = [8, 128], strides = [1, 1]} : vector<8x512xf32> to vector<8x128xf32>
    %112 = math.tanh %111 : vector<8x128xf32>
    %113 = vector.extract_strided_slice %98 {offsets = [0, 384], sizes = [8, 128], strides = [1, 1]} : vector<8x512xf32> to vector<8x128xf32>
    %114 = arith.negf %113 : vector<8x128xf32>
    %115 = math.exp %114 : vector<8x128xf32>
    %cst_30 = arith.constant 1.000000e+00 : f32
    %116 = vector.broadcast %cst_30 : f32 to vector<8x128xf32>
    %117 = arith.addf %116, %115 : vector<8x128xf32>
    %118 = arith.divf %116, %117 : vector<8x128xf32>
    %119 = arith.mulf %110, %92 : vector<8x128xf32>
    %120 = arith.mulf %104, %112 : vector<8x128xf32>
    %121 = arith.addf %119, %120 : vector<8x128xf32>
    %122 = math.tanh %121 : vector<8x128xf32>
    %123 = arith.mulf %118, %122 : vector<8x128xf32>
    %c24 = arith.constant 24 : index
    %c0_31 = arith.constant 0 : index
    %124 = vector.load %arg9[%c24, %c0_31] : memref<64x128xf32, #tpu.memory_space<vmem>>, vector<8x128xf32>
    tpu.vector_store %arg9[%c24, %c0_31], %123 {strides = array<i32>} : memref<64x128xf32, #tpu.memory_space<vmem>>, vector<8x128xf32>,
    %125 = vector.extract_strided_slice %5 {offsets = [32, 0], sizes = [8, 512], strides = [1, 1]} : vector<64x512xf32> to vector<8x512xf32>
    %cst_32 = arith.constant dense<0.000000e+00> : vector<8x512xf32>
    %126 = tpu.matmul %123, %6, %cst_32 {dimension_numbers = #tpu.dot_dimension_numbers<[1], [0], [0], [1], [0, 0, 1, 1], [], []>} : vector<8x128xf32>, vector<128x512xf32>, vector<8x512xf32> -> vector<8x512xf32>
    %127 = arith.addf %125, %126 : vector<8x512xf32>
    %128 = vector.extract_strided_slice %127 {offsets = [0, 0], sizes = [8, 128], strides = [1, 1]} : vector<8x512xf32> to vector<8x128xf32>
    %129 = arith.negf %128 : vector<8x128xf32>
    %130 = math.exp %129 : vector<8x128xf32>
    %cst_33 = arith.constant 1.000000e+00 : f32
    %131 = vector.broadcast %cst_33 : f32 to vector<8x128xf32>
    %132 = arith.addf %131, %130 : vector<8x128xf32>
    %133 = arith.divf %131, %132 : vector<8x128xf32>
    %134 = vector.extract_strided_slice %127 {offsets = [0, 128], sizes = [8, 128], strides = [1, 1]} : vector<8x512xf32> to vector<8x128xf32>
    %135 = arith.negf %134 : vector<8x128xf32>
    %136 = math.exp %135 : vector<8x128xf32>
    %cst_34 = arith.constant 1.000000e+00 : f32
    %137 = vector.broadcast %cst_34 : f32 to vector<8x128xf32>
    %138 = arith.addf %137, %136 : vector<8x128xf32>
    %139 = arith.divf %137, %138 : vector<8x128xf32>
    %140 = vector.extract_strided_slice %127 {offsets = [0, 256], sizes = [8, 128], strides = [1, 1]} : vector<8x512xf32> to vector<8x128xf32>
    %141 = math.tanh %140 : vector<8x128xf32>
    %142 = vector.extract_strided_slice %127 {offsets = [0, 384], sizes = [8, 128], strides = [1, 1]} : vector<8x512xf32> to vector<8x128xf32>
    %143 = arith.negf %142 : vector<8x128xf32>
    %144 = math.exp %143 : vector<8x128xf32>
    %cst_35 = arith.constant 1.000000e+00 : f32
    %145 = vector.broadcast %cst_35 : f32 to vector<8x128xf32>
    %146 = arith.addf %145, %144 : vector<8x128xf32>
    %147 = arith.divf %145, %146 : vector<8x128xf32>
    %148 = arith.mulf %139, %121 : vector<8x128xf32>
    %149 = arith.mulf %133, %141 : vector<8x128xf32>
    %150 = arith.addf %148, %149 : vector<8x128xf32>
    %151 = math.tanh %150 : vector<8x128xf32>
    %152 = arith.mulf %147, %151 : vector<8x128xf32>
    %c32 = arith.constant 32 : index
    %c0_36 = arith.constant 0 : index
    %153 = vector.load %arg9[%c32, %c0_36] : memref<64x128xf32, #tpu.memory_space<vmem>>, vector<8x128xf32>
    tpu.vector_store %arg9[%c32, %c0_36], %152 {strides = array<i32>} : memref<64x128xf32, #tpu.memory_space<vmem>>, vector<8x128xf32>,
    %154 = vector.extract_strided_slice %5 {offsets = [40, 0], sizes = [8, 512], strides = [1, 1]} : vector<64x512xf32> to vector<8x512xf32>
    %cst_37 = arith.constant dense<0.000000e+00> : vector<8x512xf32>
    %155 = tpu.matmul %152, %6, %cst_37 {dimension_numbers = #tpu.dot_dimension_numbers<[1], [0], [0], [1], [0, 0, 1, 1], [], []>} : vector<8x128xf32>, vector<128x512xf32>, vector<8x512xf32> -> vector<8x512xf32>
    %156 = arith.addf %154, %155 : vector<8x512xf32>
    %157 = vector.extract_strided_slice %156 {offsets = [0, 0], sizes = [8, 128], strides = [1, 1]} : vector<8x512xf32> to vector<8x128xf32>
    %158 = arith.negf %157 : vector<8x128xf32>
    %159 = math.exp %158 : vector<8x128xf32>
    %cst_38 = arith.constant 1.000000e+00 : f32
    %160 = vector.broadcast %cst_38 : f32 to vector<8x128xf32>
    %161 = arith.addf %160, %159 : vector<8x128xf32>
    %162 = arith.divf %160, %161 : vector<8x128xf32>
    %163 = vector.extract_strided_slice %156 {offsets = [0, 128], sizes = [8, 128], strides = [1, 1]} : vector<8x512xf32> to vector<8x128xf32>
    %164 = arith.negf %163 : vector<8x128xf32>
    %165 = math.exp %164 : vector<8x128xf32>
    %cst_39 = arith.constant 1.000000e+00 : f32
    %166 = vector.broadcast %cst_39 : f32 to vector<8x128xf32>
    %167 = arith.addf %166, %165 : vector<8x128xf32>
    %168 = arith.divf %166, %167 : vector<8x128xf32>
    %169 = vector.extract_strided_slice %156 {offsets = [0, 256], sizes = [8, 128], strides = [1, 1]} : vector<8x512xf32> to vector<8x128xf32>
    %170 = math.tanh %169 : vector<8x128xf32>
    %171 = vector.extract_strided_slice %156 {offsets = [0, 384], sizes = [8, 128], strides = [1, 1]} : vector<8x512xf32> to vector<8x128xf32>
    %172 = arith.negf %171 : vector<8x128xf32>
    %173 = math.exp %172 : vector<8x128xf32>
    %cst_40 = arith.constant 1.000000e+00 : f32
    %174 = vector.broadcast %cst_40 : f32 to vector<8x128xf32>
    %175 = arith.addf %174, %173 : vector<8x128xf32>
    %176 = arith.divf %174, %175 : vector<8x128xf32>
    %177 = arith.mulf %168, %150 : vector<8x128xf32>
    %178 = arith.mulf %162, %170 : vector<8x128xf32>
    %179 = arith.addf %177, %178 : vector<8x128xf32>
    %180 = math.tanh %179 : vector<8x128xf32>
    %181 = arith.mulf %176, %180 : vector<8x128xf32>
    %c40 = arith.constant 40 : index
    %c0_41 = arith.constant 0 : index
    %182 = vector.load %arg9[%c40, %c0_41] : memref<64x128xf32, #tpu.memory_space<vmem>>, vector<8x128xf32>
    tpu.vector_store %arg9[%c40, %c0_41], %181 {strides = array<i32>} : memref<64x128xf32, #tpu.memory_space<vmem>>, vector<8x128xf32>,
    %183 = vector.extract_strided_slice %5 {offsets = [48, 0], sizes = [8, 512], strides = [1, 1]} : vector<64x512xf32> to vector<8x512xf32>
    %cst_42 = arith.constant dense<0.000000e+00> : vector<8x512xf32>
    %184 = tpu.matmul %181, %6, %cst_42 {dimension_numbers = #tpu.dot_dimension_numbers<[1], [0], [0], [1], [0, 0, 1, 1], [], []>} : vector<8x128xf32>, vector<128x512xf32>, vector<8x512xf32> -> vector<8x512xf32>
    %185 = arith.addf %183, %184 : vector<8x512xf32>
    %186 = vector.extract_strided_slice %185 {offsets = [0, 0], sizes = [8, 128], strides = [1, 1]} : vector<8x512xf32> to vector<8x128xf32>
    %187 = arith.negf %186 : vector<8x128xf32>
    %188 = math.exp %187 : vector<8x128xf32>
    %cst_43 = arith.constant 1.000000e+00 : f32
    %189 = vector.broadcast %cst_43 : f32 to vector<8x128xf32>
    %190 = arith.addf %189, %188 : vector<8x128xf32>
    %191 = arith.divf %189, %190 : vector<8x128xf32>
    %192 = vector.extract_strided_slice %185 {offsets = [0, 128], sizes = [8, 128], strides = [1, 1]} : vector<8x512xf32> to vector<8x128xf32>
    %193 = arith.negf %192 : vector<8x128xf32>
    %194 = math.exp %193 : vector<8x128xf32>
    %cst_44 = arith.constant 1.000000e+00 : f32
    %195 = vector.broadcast %cst_44 : f32 to vector<8x128xf32>
    %196 = arith.addf %195, %194 : vector<8x128xf32>
    %197 = arith.divf %195, %196 : vector<8x128xf32>
    %198 = vector.extract_strided_slice %185 {offsets = [0, 256], sizes = [8, 128], strides = [1, 1]} : vector<8x512xf32> to vector<8x128xf32>
    %199 = math.tanh %198 : vector<8x128xf32>
    %200 = vector.extract_strided_slice %185 {offsets = [0, 384], sizes = [8, 128], strides = [1, 1]} : vector<8x512xf32> to vector<8x128xf32>
    %201 = arith.negf %200 : vector<8x128xf32>
    %202 = math.exp %201 : vector<8x128xf32>
    %cst_45 = arith.constant 1.000000e+00 : f32
    %203 = vector.broadcast %cst_45 : f32 to vector<8x128xf32>
    %204 = arith.addf %203, %202 : vector<8x128xf32>
    %205 = arith.divf %203, %204 : vector<8x128xf32>
    %206 = arith.mulf %197, %179 : vector<8x128xf32>
    %207 = arith.mulf %191, %199 : vector<8x128xf32>
    %208 = arith.addf %206, %207 : vector<8x128xf32>
    %209 = math.tanh %208 : vector<8x128xf32>
    %210 = arith.mulf %205, %209 : vector<8x128xf32>
    %c48 = arith.constant 48 : index
    %c0_46 = arith.constant 0 : index
    %211 = vector.load %arg9[%c48, %c0_46] : memref<64x128xf32, #tpu.memory_space<vmem>>, vector<8x128xf32>
    tpu.vector_store %arg9[%c48, %c0_46], %210 {strides = array<i32>} : memref<64x128xf32, #tpu.memory_space<vmem>>, vector<8x128xf32>,
    %212 = vector.extract_strided_slice %5 {offsets = [56, 0], sizes = [8, 512], strides = [1, 1]} : vector<64x512xf32> to vector<8x512xf32>
    %cst_47 = arith.constant dense<0.000000e+00> : vector<8x512xf32>
    %213 = tpu.matmul %210, %6, %cst_47 {dimension_numbers = #tpu.dot_dimension_numbers<[1], [0], [0], [1], [0, 0, 1, 1], [], []>} : vector<8x128xf32>, vector<128x512xf32>, vector<8x512xf32> -> vector<8x512xf32>
    %214 = arith.addf %212, %213 : vector<8x512xf32>
    %215 = vector.extract_strided_slice %214 {offsets = [0, 0], sizes = [8, 128], strides = [1, 1]} : vector<8x512xf32> to vector<8x128xf32>
    %216 = arith.negf %215 : vector<8x128xf32>
    %217 = math.exp %216 : vector<8x128xf32>
    %cst_48 = arith.constant 1.000000e+00 : f32
    %218 = vector.broadcast %cst_48 : f32 to vector<8x128xf32>
    %219 = arith.addf %218, %217 : vector<8x128xf32>
    %220 = arith.divf %218, %219 : vector<8x128xf32>
    %221 = vector.extract_strided_slice %214 {offsets = [0, 128], sizes = [8, 128], strides = [1, 1]} : vector<8x512xf32> to vector<8x128xf32>
    %222 = arith.negf %221 : vector<8x128xf32>
    %223 = math.exp %222 : vector<8x128xf32>
    %cst_49 = arith.constant 1.000000e+00 : f32
    %224 = vector.broadcast %cst_49 : f32 to vector<8x128xf32>
    %225 = arith.addf %224, %223 : vector<8x128xf32>
    %226 = arith.divf %224, %225 : vector<8x128xf32>
    %227 = vector.extract_strided_slice %214 {offsets = [0, 256], sizes = [8, 128], strides = [1, 1]} : vector<8x512xf32> to vector<8x128xf32>
    %228 = math.tanh %227 : vector<8x128xf32>
    %229 = vector.extract_strided_slice %214 {offsets = [0, 384], sizes = [8, 128], strides = [1, 1]} : vector<8x512xf32> to vector<8x128xf32>
    %230 = arith.negf %229 : vector<8x128xf32>
    %231 = math.exp %230 : vector<8x128xf32>
    %cst_50 = arith.constant 1.000000e+00 : f32
    %232 = vector.broadcast %cst_50 : f32 to vector<8x128xf32>
    %233 = arith.addf %232, %231 : vector<8x128xf32>
    %234 = arith.divf %232, %233 : vector<8x128xf32>
    %235 = arith.mulf %226, %208 : vector<8x128xf32>
    %236 = arith.mulf %220, %228 : vector<8x128xf32>
    %237 = arith.addf %235, %236 : vector<8x128xf32>
    %238 = math.tanh %237 : vector<8x128xf32>
    %239 = arith.mulf %234, %238 : vector<8x128xf32>
    %c56 = arith.constant 56 : index
    %c0_51 = arith.constant 0 : index
    %240 = vector.load %arg9[%c56, %c0_51] : memref<64x128xf32, #tpu.memory_space<vmem>>, vector<8x128xf32>
    tpu.vector_store %arg9[%c56, %c0_51], %239 {strides = array<i32>} : memref<64x128xf32, #tpu.memory_space<vmem>>, vector<8x128xf32>,
    %c0_52 = arith.constant 0 : index
    %c0_53 = arith.constant 0 : index
    %241 = vector.load %arg9[%c0_52, %c0_53] : memref<64x128xf32, #tpu.memory_space<vmem>>, vector<64x128xf32>
    %c0_54 = arith.constant 0 : index
    %c0_55 = arith.constant 0 : index
    %242 = vector.load %arg6[%c0_54, %c0_55] : memref<128x128xf32, #tpu.memory_space<vmem>>, vector<128x128xf32>
    %cst_56 = arith.constant dense<0.000000e+00> : vector<64x128xf32>
    %243 = tpu.matmul %241, %242, %cst_56 {dimension_numbers = #tpu.dot_dimension_numbers<[1], [0], [0], [1], [0, 0, 1, 1], [], []>} : vector<64x128xf32>, vector<128x128xf32>, vector<64x128xf32> -> vector<64x128xf32>
    %c0_57 = arith.constant 0 : index
    %c0_58 = arith.constant 0 : index
    %244 = vector.load %arg7[%c0_57, %c0_58] : memref<1x128xf32, #tpu.memory_space<vmem>>, vector<1x128xf32>
    %245 = vector.broadcast %244 : vector<1x128xf32> to vector<64x128xf32>
    %246 = arith.addf %243, %245 : vector<64x128xf32>
    %c0_59 = arith.constant 0 : index
    %c0_60 = arith.constant 0 : index
    %247 = vector.load %arg8[%c0_59, %c0_60] : memref<64x128xf32, #tpu.memory_space<vmem>>, vector<64x128xf32>
    tpu.vector_store %arg8[%c0_59, %c0_60], %246 {strides = array<i32>} : memref<64x128xf32, #tpu.memory_space<vmem>>, vector<64x128xf32>,
    return
  }
}

</mosaic_0001>

<bundles_post_ra>
// kernel: tpu_custom_call.1
= control target key start
LH: loop header
LB: loop body
LE: loop exit
PB: predicated region body
PF: predicated region fallthrough
CT: control target
= control target key end

     0   :  { %13 = vsyncpa [#allocation4], 0  ;;  %s3772_s0 = inlined_call_operand.hbm [shape: f32[64,128], index: 0, kind: input, shape index: {}]   ;;  %s3773_s1 = inlined_call_operand.hbm [shape: f32[8,128], index: 1, kind: input, shape index: {}]   ;;  %s3774_s2 = inlined_call_operand.hbm [shape: f32[8,128], index: 2, kind: input, shape index: {}]   ;;  %s3775_s3 = inlined_call_operand.hbm [shape: f32[128,512], index: 3, kind: input, shape index: {}]   ;;  %s3776_s4 = inlined_call_operand.hbm [shape: f32[128,512], index: 4, kind: input, shape index: {}]   ;;  %s3777_s5 = inlined_call_operand.vmem [shape: f32[1,512], index: 5, kind: input, shape index: {}]   ;;  %s3778_s6 = inlined_call_operand.hbm [shape: f32[128,128], index: 6, kind: input, shape index: {}]   ;;  %s3779_s7 = inlined_call_operand.vmem [shape: f32[1,128], index: 7, kind: input, shape index: {}]   ;;  %s3780_s8 = inlined_call_operand.hbm [shape: f32[64,128], index: 8, kind: output, shape index: {}]  }
   0x1   :  { %14 = vsyncpa [#allocation7], 0 }
   0x2   :  { %15 = vsyncpa [#allocation10], 0 }
   0x3   :  { %16 = vsyncpa [#allocation13], 0 }
   0x4   :  { %17 = vsyncpa [#allocation5], 0  ;;  %s3095_s27 = smov [#allocation6]   ;;  %s3096_s29 = smov [#allocation9]  }
   0x5   :  { %s36_s28 = sshll.u32 %s3095_s27, 4  ;;  %s55_s30 = sshll.u32 %s3096_s29, 4  ;;  %s37_s28 = int_to_ptr.vmem [resolvable:$true] %s36_s28  ;;  %s3152_s30 = int_to_ptr.vmem [resolvable:$true] %s55_s30 }
   0x6   :  { %s2931_s11 = scalar_lea.hbm %s3773_s1, 128 }
   0x7   :  { %p2932_p0 = scmp.ne.s32.totalorder %s3773_s1, %s2931_s11  ;;  %p2935_p1 = scmp.lt.u32.totalorder %s2931_s11, %s3773_s1 }
   0x9   :  { %p2937_p2 = pnand %p2935_p1, %p2932_p0 }
   0xb   :  { %2940 = shalt.err (!%p2937_p2)
}
   0xc   :  { %s2941_s16 = scalar_lea.vmem %s37_s28, 128  ;;  %p2946_p4 = scmp.lt.s32.totalorder %s37_s28, %s37_s28 }
   0xd   :  { %p2942_p3 = scmp.ne.s32.totalorder %s37_s28, %s2941_s16  ;;  %p2947_p5 = scmp.lt.s32.totalorder %s2941_s16, %s2941_s16 }
   0xf   :  { %p2948_p6 = por %p2947_p5, %p2946_p4 }
  0x11   :  { %p2949_p7 = pnand %p2948_p6, %p2942_p3 }
  0x13   :  { %2952 = shalt.err (!%p2949_p7)
}
  0x14   :  { %39 = dma.hbm_to_vmem [thread:$0]  %s3773_s1, 128, %s37_s28, [#allocation7]  }
  0x15   :  { %s2953_s21 = scalar_lea.hbm %s3775_s3, 8192 }
  0x16   :  { %p2954_p8 = scmp.ne.s32.totalorder %s3775_s3, %s2953_s21  ;;  %p2957_p9 = scmp.lt.u32.totalorder %s2953_s21, %s3775_s3 }
  0x18   :  { %p2959_p10 = pnand %p2957_p9, %p2954_p8 }
  0x1a   :  { %2962 = shalt.err (!%p2959_p10)
}
  0x1b   :  { %s2963_s26 = scalar_lea.vmem %s3152_s30, 8192  ;;  %p2968_p12 = scmp.lt.s32.totalorder %s3152_s30, %s3152_s30 }
  0x1c   :  { %p2964_p11 = scmp.ne.s32.totalorder %s3152_s30, %s2963_s26  ;;  %p2969_p13 = scmp.lt.s32.totalorder %s2963_s26, %s2963_s26 }
  0x1e   :  { %p2970_p0 = por %p2969_p13, %p2968_p12 }
  0x20   :  { %p2971_p1 = pnand %p2970_p0, %p2964_p11 }
  0x22   :  { %2974 = shalt.err (!%p2971_p1)
}
  0x23   :  { %s3097_s1 = smov 512   ;;  %s3098_s27 = smov 32  }
  0x24   :  { %61 = dma.hbm_to_vmem [thread:$0]  %s3775_s3, 8192, %s3152_s30, [#allocation10], %s3097_s1, %s3097_s1, %s3098_s27  }
  0x25   :  { %s3099_s9 = smov [#allocation3]   ;;  %s2975_s13 = scalar_lea.hbm %s3772_s0, 1024 }
  0x26   :  { %s23_s10 = sshll.u32 %s3099_s9, 4  ;;  %p2976_p2 = scmp.ne.s32.totalorder %s3772_s0, %s2975_s13  ;;  %s24_s10 = int_to_ptr.vmem [resolvable:$true] %s23_s10 }
  0x27   :  { %p2979_p3 = scmp.lt.u32.totalorder %s2975_s13, %s3772_s0 }
  0x29   :  { %p2981_p4 = pnand %p2979_p3, %p2976_p2 }
  0x2b   :  { %2984 = shalt.err (!%p2981_p4)
}
  0x2c   :  { %s2985_s18 = scalar_lea.vmem %s24_s10, 1024  ;;  %p2990_p6 = scmp.lt.s32.totalorder %s24_s10, %s24_s10 }
  0x2d   :  { %p2986_p5 = scmp.ne.s32.totalorder %s24_s10, %s2985_s18  ;;  %p2991_p7 = scmp.lt.s32.totalorder %s2985_s18, %s2985_s18 }
  0x2f   :  { %p2992_p8 = por %p2991_p7, %p2990_p6 }
  0x31   :  { %p2993_p9 = pnand %p2992_p8, %p2986_p5 }
  0x33   :  { %2996 = shalt.err (!%p2993_p9)
}
  0x34   :  { %s3100_s3 = smov 128   ;;  %s3101_s30 = smov 8  }
  0x35   :  { %29 = dma.hbm_to_vmem [thread:$0]  %s3772_s0, 1024, %s24_s10, [#allocation4], %s3100_s3, %s3100_s3, %s3101_s30  }
  0x36   :  { %s3102_s21 = smov [#allocation8]   ;;  %s3103_s23 = smov [#allocation11]  }
  0x37   :  { %s46_s22 = sshll.u32 %s3102_s21, 4  ;;  %s67_s24 = sshll.u32 %s3103_s23, 4  ;;  %s47_s22 = int_to_ptr.vmem [resolvable:$true] %s46_s22  ;;  %s68_s24 = int_to_ptr.vmem [resolvable:$true] %s67_s24 }
  0x38   :  { %s2997_s28 = scalar_lea.hbm %s3774_s2, 128 }
  0x39   :  { %p2998_p10 = scmp.ne.s32.totalorder %s3774_s2, %s2997_s28  ;;  %p3001_p11 = scmp.lt.u32.totalorder %s2997_s28, %s3774_s2 }
  0x3b   :  { %p3003_p12 = pnand %p3001_p11, %p2998_p10 }
  0x3d   :  { %3006 = shalt.err (!%p3003_p12)
}
  0x3e   :  { %s3007_s0 = scalar_lea.vmem %s47_s22, 128  ;;  %p3012_p0 = scmp.lt.s32.totalorder %s47_s22, %s47_s22 }
  0x3f   :  { %p3008_p13 = scmp.ne.s32.totalorder %s47_s22, %s3007_s0  ;;  %p3013_p1 = scmp.lt.s32.totalorder %s3007_s0, %s3007_s0 }
  0x41   :  { %p3014_p2 = por %p3013_p1, %p3012_p0 }
  0x43   :  { %p3015_p3 = pnand %p3014_p2, %p3008_p13 }
  0x45   :  { %3018 = shalt.err (!%p3015_p3)
}
  0x46   :  { %49 = dma.hbm_to_vmem [thread:$0]  %s3774_s2, 128, %s47_s22, [#allocation7]  }
  0x47   :  { %s3019_s16 = scalar_lea.hbm %s3776_s4, 8192 }
  0x48   :  { %p3020_p4 = scmp.ne.s32.totalorder %s3776_s4, %s3019_s16  ;;  %p3023_p5 = scmp.lt.u32.totalorder %s3019_s16, %s3776_s4 }
  0x4a   :  { %p3025_p6 = pnand %p3023_p5, %p3020_p4 }
  0x4c   :  { %3028 = shalt.err (!%p3025_p6)
}
  0x4d   :  { %s3029_s21 = scalar_lea.vmem %s68_s24, 8192  ;;  %p3034_p8 = scmp.lt.s32.totalorder %s68_s24, %s68_s24 }
  0x4e   :  { %p3030_p7 = scmp.ne.s32.totalorder %s68_s24, %s3029_s21  ;;  %p3035_p9 = scmp.lt.s32.totalorder %s3029_s21, %s3029_s21 }
  0x50   :  { %p3036_p10 = por %p3035_p9, %p3034_p8 }
  0x52   :  { %p3037_p11 = pnand %p3036_p10, %p3030_p7 }
  0x54   :  { %3040 = shalt.err (!%p3037_p11)
}
  0x55   :  { %73 = dma.hbm_to_vmem [thread:$0]  %s3776_s4, 8192, %s68_s24, [#allocation10], %s3097_s1, %s3097_s1, %s3098_s27  }
  0x56   :  { %s3104_s23 = smov [#allocation12]   ;;  %s3041_s29 = scalar_lea.hbm %s3778_s6, 2048 }
  0x57   :  { %s81_s25 = sshll.u32 %s3104_s23, 4  ;;  %p3042_p12 = scmp.ne.s32.totalorder %s3778_s6, %s3041_s29  ;;  %s82_s25 = int_to_ptr.vmem [resolvable:$true] %s81_s25 }
  0x58   :  { %p3045_p13 = scmp.lt.u32.totalorder %s3041_s29, %s3778_s6 }
  0x5a   :  { %p3047_p0 = pnand %p3045_p13, %p3042_p12 }
  0x5c   :  { %3050 = shalt.err (!%p3047_p0)
}
  0x5d   :  { %s3051_s10 = scalar_lea.vmem %s82_s25, 2048  ;;  %p3056_p2 = scmp.lt.s32.totalorder %s82_s25, %s82_s25 }
  0x5e   :  { %p3052_p1 = scmp.ne.s32.totalorder %s82_s25, %s3051_s10  ;;  %p3057_p3 = scmp.lt.s32.totalorder %s3051_s10, %s3051_s10 }
  0x60   :  { %p3058_p4 = por %p3057_p3, %p3056_p2 }
  0x62   :  { %p3059_p5 = pnand %p3058_p4, %p3052_p1 }
  0x64   :  { %3062 = shalt.err (!%p3059_p5)
}
  0x65   :  { %87 = dma.hbm_to_vmem [thread:$0]  %s3778_s6, 2048, %s82_s25, [#allocation13], %s3100_s3, %s3100_s3, %s3101_s30  }
  0x66   :  { %3085 = dma.done.wait [#allocation4], 1024  }
  0x67   :  { %3086 = vsyncadd [#allocation4], 4294966272 }
  0x68   :  { %3087 = dma.done.wait [#allocation7], 256  }
  0x69   :  { %3088 = vsyncadd [#allocation7], 4294967040 }
  0x6a   :  { %3089 = dma.done.wait [#allocation10], 16384  }
  0x6b   :  { %3090 = vsyncadd [#allocation10], 4294950912 }
  0x6c   :  { %3091 = dma.done.wait [#allocation13], 2048  }
  0x6d   :  { %3092 = vsyncadd [#allocation13], 4294965248  ;;  %v3781_v0 = vmov 0.0   ;;  %v117_v1 = vld [vmem:[#allocation9 + $0x8] sm:$0xff]  ;;  %v116_v3 = vld [vmem:[#allocation9] sm:$0xff] }
  0x6e   :  { %266 = vmatprep.mubr.f32.mxu1 %v3781_v0  ;;  %558 = vmatprep.mubr.f32.mxu0 %v3781_v0  ;;  %v121_v2 = vld [vmem:[#allocation9 + $0x28] sm:$0xff]  ;;  %v120_v5 = vld [vmem:[#allocation9 + $0x20] sm:$0xff] }
  0x6f   :  { %v2119_v4 = vpack.c.bf16 %v121_v2, %v117_v1  ;;  %v429_v6 = vld [vmem:[#allocation11 + $0x8] sm:$0xff]  ;;  %v2121_v8 = vpack.c.bf16 %v120_v5, %v116_v3  ;;  %v428_v10 = vld [vmem:[#allocation11] sm:$0xff] }
  0x70   :  { %v433_v7 = vld [vmem:[#allocation11 + $0x28] sm:$0xff]  ;;  %v432_v11 = vld [vmem:[#allocation11 + $0x20] sm:$0xff] }
  0x71   :  { %v3245_v9 = vpack.c.bf16 %v433_v7, %v429_v6  ;;  %v125_v12 = vld [vmem:[#allocation9 + $0x48] sm:$0xff]  ;;  %2120 = vmatprep.subr.bf16.mxu1 %v2119_v4  ;;  %v3247_v13 = vpack.c.bf16 %v432_v11, %v428_v10  ;;  %v124_v15 = vld [vmem:[#allocation9 + $0x40] sm:$0xff] }
  0x72   :  { %v129_v14 = vld [vmem:[#allocation9 + $0x68] sm:$0xff]  ;;  %v128_v16 = vld [vmem:[#allocation9 + $0x60] sm:$0xff]  ;;  %2122 = vmatpush1.bf16.msra.mxu1 %v2121_v8 }
  0x73   :  { %2184 = vmatprep.subr.bf16.mxu0 %v3245_v9  ;;  %v2123_v17 = vpack.c.bf16 %v129_v14, %v125_v12  ;;  %v2125_v18 = vpack.c.bf16 %v128_v16, %v124_v15  ;;  %v437_v19 = vld [vmem:[#allocation11 + $0x48] sm:$0xff]  ;;  %v436_v21 = vld [vmem:[#allocation11 + $0x40] sm:$0xff] }
  0x74   :  { %v441_v20 = vld [vmem:[#allocation11 + $0x68] sm:$0xff]  ;;  %2186 = vmatpush1.bf16.msra.mxu0 %v3247_v13  ;;  %v440_v23 = vld [vmem:[#allocation11 + $0x60] sm:$0xff] }
  0x75   :  { %v3251_v22 = vpack.c.bf16 %v441_v20, %v437_v19  ;;  %v133_v24 = vld [vmem:[#allocation9 + $0x88] sm:$0xff]  ;;  %2124 = vmatprep.subr.bf16.mxu1 %v2123_v17  ;;  %v3253_v26 = vpack.c.bf16 %v440_v23, %v436_v21  ;;  %v132_v28 = vld [vmem:[#allocation9 + $0x80] sm:$0xff] }
  0x76   :  { %v137_v25 = vld [vmem:[#allocation9 + $0xa8] sm:$0xff]  ;;  %v136_v29 = vld [vmem:[#allocation9 + $0xa0] sm:$0xff]  ;;  %2126 = vmatpush1.bf16.msra.mxu1 %v2125_v18 }
  0x77   :  { %v2127_v27 = vpack.c.bf16 %v137_v25, %v133_v24  ;;  %v445_v30 = vld [vmem:[#allocation11 + $0x88] sm:$0xff]  ;;  %2188 = vmatprep.subr.bf16.mxu0 %v3251_v22  ;;  %v444_v32 = vld [vmem:[#allocation11 + $0x80] sm:$0xff]  ;;  %v2129_v34 = vpack.c.bf16 %v136_v29, %v132_v28 }
  0x78   :  { %v449_v31 = vld [vmem:[#allocation11 + $0xa8] sm:$0xff]  ;;  %v448_v33 = vld [vmem:[#allocation11 + $0xa0] sm:$0xff]  ;;  %2190 = vmatpush1.bf16.msra.mxu0 %v3253_v26 }
  0x79   :  { %v3256_v35 = vpack.c.bf16 %v449_v31, %v445_v30  ;;  %v141_v36 = vld [vmem:[#allocation9 + $0xc8] sm:$0xff]  ;;  %v140_v38 = vld [vmem:[#allocation9 + $0xc0] sm:$0xff]  ;;  %2128 = vmatprep.subr.bf16.mxu1 %v2127_v27  ;;  %v3259_v39 = vpack.c.bf16 %v448_v33, %v444_v32 }
  0x7a   :  { %v145_v37 = vld [vmem:[#allocation9 + $0xe8] sm:$0xff]  ;;  %v144_v41 = vld [vmem:[#allocation9 + $0xe0] sm:$0xff]  ;;  %2130 = vmatpush1.bf16.msra.mxu1 %v2129_v34 }
  0x7b   :  { %v2131_v40 = vpack.c.bf16 %v145_v37, %v141_v36  ;;  %v453_v42 = vld [vmem:[#allocation11 + $0xc8] sm:$0xff]  ;;  %2192 = vmatprep.subr.bf16.mxu0 %v3256_v35  ;;  %v452_v45 = vld [vmem:[#allocation11 + $0xc0] sm:$0xff]  ;;  %v2133_v49 = vpack.c.bf16 %v144_v41, %v140_v38  ;;  %v119_v37 = vld [vmem:[#allocation9 + $0x18] sm:$0xff] }
  0x7c   :  { %v457_v43 = vld [vmem:[#allocation11 + $0xe8] sm:$0xff]  ;;  %v456_v46 = vld [vmem:[#allocation11 + $0xe0] sm:$0xff]  ;;  %2194 = vmatpush1.bf16.msra.mxu0 %v3259_v39  ;;  %v123_v38 = vld [vmem:[#allocation9 + $0x38] sm:$0xff] }
  0x7d   :  { %v3262_v44 = vpack.c.bf16 %v457_v43, %v453_v42  ;;  %v149_v47 = vld [vmem:[#allocation9 + $0x108] sm:$0xff]  ;;  %2132 = vmatprep.subr.bf16.mxu1 %v2131_v40  ;;  %v3265_v52 = vpack.c.bf16 %v456_v46, %v452_v45  ;;  %v148_v54 = vld [vmem:[#allocation9 + $0x100] sm:$0xff]  ;;  %v2151_v42 = vpack.c.bf16 %v123_v38, %v119_v37  ;;  %v118_v43 = vld [vmem:[#allocation9 + $0x10] sm:$0xff] }
  0x7e   :  { %v153_v48 = vld [vmem:[#allocation9 + $0x128] sm:$0xff]  ;;  %v152_v55 = vld [vmem:[#allocation9 + $0x120] sm:$0xff]  ;;  %2134 = vmatpush1.bf16.msra.mxu1 %v2133_v49  ;;  %v122_v45 = vld [vmem:[#allocation9 + $0x30] sm:$0xff] }
  0x7f   :  { %v461_v50 = vld [vmem:[#allocation11 + $0x108] sm:$0xff]  ;;  %v2135_v53 = vpack.c.bf16 %v153_v48, %v149_v47  ;;  %v460_v56 = vld [vmem:[#allocation11 + $0x100] sm:$0xff]  ;;  %2196 = vmatprep.subr.bf16.mxu0 %v3262_v44  ;;  %v2137_v63 = vpack.c.bf16 %v152_v55, %v148_v54  ;;  %v127_v46 = vld [vmem:[#allocation9 + $0x58] sm:$0xff]  ;;  %v2153_v49 = vpack.c.bf16 %v122_v45, %v118_v43 }
  0x80   :  { %v465_v51 = vld [vmem:[#allocation11 + $0x128] sm:$0xff]  ;;  %v464_v58 = vld [vmem:[#allocation11 + $0x120] sm:$0xff]  ;;  %2198 = vmatpush1.bf16.msra.mxu0 %v3265_v52  ;;  %v131_v47 = vld [vmem:[#allocation9 + $0x78] sm:$0xff] }
  0x81   :  { %v3268_v57 = vpack.c.bf16 %v465_v51, %v461_v50  ;;  %v157_v59 = vld [vmem:[#allocation9 + $0x148] sm:$0xff]  ;;  %2136 = vmatprep.subr.bf16.mxu1 %v2135_v53  ;;  %v3271_v1 = vpack.c.bf16 %v464_v58, %v460_v56  ;;  %v156_v3 = vld [vmem:[#allocation9 + $0x140] sm:$0xff]  ;;  %v3292_v48 = vld [vmem:[#allocation3] sm:$0xff]  ;;  %v2155_v51 = vpack.c.bf16 %v131_v47, %v127_v46 }
  0x82   :  { %v161_v60 = vld [vmem:[#allocation9 + $0x168] sm:$0xff]  ;;  %v160_v4 = vld [vmem:[#allocation9 + $0x160] sm:$0xff]  ;;  %2138 = vmatpush1.bf16.msra.mxu1 %v2137_v63  ;;  %v3295_v50 = vld [vmem:[#allocation6] sm:$0xff] }
  0x83   :  { %v469_v61 = vld [vmem:[#allocation11 + $0x148] sm:$0xff]  ;;  %v2139_v2 = vpack.c.bf16 %v161_v60, %v157_v59  ;;  %v468_v5 = vld [vmem:[#allocation11 + $0x140] sm:$0xff]  ;;  %2200 = vmatprep.subr.bf16.mxu0 %v3268_v57  ;;  %v2141_v14 = vpack.c.bf16 %v160_v4, %v156_v3  ;;  %v126_v53 = vld [vmem:[#allocation9 + $0x50] sm:$0xff] }
  0x84   :  { %v473_v62 = vld [vmem:[#allocation11 + $0x168] sm:$0xff]  ;;  %v472_v7 = vld [vmem:[#allocation11 + $0x160] sm:$0xff]  ;;  %2202 = vmatpush1.bf16.msra.mxu0 %v3271_v1  ;;  %v130_v54 = vld [vmem:[#allocation9 + $0x70] sm:$0xff] }
  0x85   :  { %v3274_v6 = vpack.c.bf16 %v473_v62, %v469_v61  ;;  %v165_v8 = vld [vmem:[#allocation9 + $0x188] sm:$0xff]  ;;  %2140 = vmatprep.subr.bf16.mxu1 %v2139_v2  ;;  %v3277_v15 = vpack.c.bf16 %v472_v7, %v468_v5  ;;  %v164_v17 = vld [vmem:[#allocation9 + $0x180] sm:$0xff]  ;;  %v135_v55 = vld [vmem:[#allocation9 + $0x98] sm:$0xff]  ;;  %v2157_v59 = vpack.c.bf16 %v130_v54, %v126_v53 }
  0x86   :  { %v169_v10 = vld [vmem:[#allocation9 + $0x1a8] sm:$0xff]  ;;  %v168_v18 = vld [vmem:[#allocation9 + $0x1a0] sm:$0xff]  ;;  %2142 = vmatpush1.bf16.msra.mxu1 %v2141_v14  ;;  %v139_v56 = vld [vmem:[#allocation9 + $0xb8] sm:$0xff] }
  0x87   :  { %v477_v11 = vld [vmem:[#allocation11 + $0x188] sm:$0xff]  ;;  %v2143_v16 = vpack.c.bf16 %v169_v10, %v165_v8  ;;  %v476_v19 = vld [vmem:[#allocation11 + $0x180] sm:$0xff]  ;;  %2204 = vmatprep.subr.bf16.mxu0 %v3274_v6  ;;  %v2145_v28 = vpack.c.bf16 %v168_v18, %v164_v17  ;;  %v3300_v58 = vld [vmem:[#allocation3 + $0x8] sm:$0xff]  ;;  %v2159_v60 = vpack.c.bf16 %v139_v56, %v135_v55 }
  0x88   :  { %v481_v12 = vld [vmem:[#allocation11 + $0x1a8] sm:$0xff]  ;;  %v480_v21 = vld [vmem:[#allocation11 + $0x1a0] sm:$0xff]  ;;  %2206 = vmatpush1.bf16.msra.mxu0 %v3277_v15  ;;  %v134_v61 = vld [vmem:[#allocation9 + $0x90] sm:$0xff] }
  0x89   :  { %v3280_v20 = vpack.c.bf16 %v481_v12, %v477_v11  ;;  %v173_v23 = vld [vmem:[#allocation9 + $0x1c8] sm:$0xff]  ;;  %2144 = vmatprep.subr.bf16.mxu1 %v2143_v16  ;;  %v3283_v29 = vpack.c.bf16 %v480_v21, %v476_v19  ;;  %v172_v31 = vld [vmem:[#allocation9 + $0x1c0] sm:$0xff]  ;;  %v138_v62 = vld [vmem:[#allocation9 + $0xb0] sm:$0xff] }
  0x8a   :  { %v177_v24 = vld [vmem:[#allocation9 + $0x1e8] sm:$0xff]  ;;  %v176_v32 = vld [vmem:[#allocation9 + $0x1e0] sm:$0xff]  ;;  %2146 = vmatpush1.bf16.msra.mxu1 %v2145_v28  ;;  %v143_v63 = vld [vmem:[#allocation9 + $0xd8] sm:$0xff]  ;;  %v2161_v4 = vpack.c.bf16 %v138_v62, %v134_v61 }
  0x8b   :  { %v485_v25 = vld [vmem:[#allocation11 + $0x1c8] sm:$0xff]  ;;  %v2147_v30 = vpack.c.bf16 %v177_v24, %v173_v23  ;;  %v484_v33 = vld [vmem:[#allocation11 + $0x1c0] sm:$0xff]  ;;  %2208 = vmatprep.subr.bf16.mxu0 %v3280_v20  ;;  %v2149_v40 = vpack.c.bf16 %v176_v32, %v172_v31  ;;  %v147_v2 = vld [vmem:[#allocation9 + $0xf8] sm:$0xff] }
  0x8c   :  { %v489_v27 = vld [vmem:[#allocation11 + $0x1e8] sm:$0xff]  ;;  %v488_v36 = vld [vmem:[#allocation11 + $0x1e0] sm:$0xff]  ;;  %2210 = vmatpush1.bf16.msra.mxu0 %v3283_v29  ;;  %v2163_v5 = vpack.c.bf16 %v147_v2, %v143_v63  ;;  %v142_v7 = vld [vmem:[#allocation9 + $0xd0] sm:$0xff] }
  0x8d   :  { %v3286_v34 = vpack.c.bf16 %v489_v27, %v485_v25  ;;  %2148 = vmatprep.subr.bf16.mxu1 %v2147_v30  ;;  %v3289_v41 = vpack.c.bf16 %v488_v36, %v484_v33  ;;  %v3308_v3 = vld [vmem:[#allocation3 + $0x10] sm:$0xff]  ;;  %v146_v8 = vld [vmem:[#allocation9 + $0xf0] sm:$0xff]  ;;  %v151_v10 = vld [vmem:[#allocation9 + $0x118] sm:$0xff] }
  0x8e   :  { %2150 = vmatpush1.bf16.msra.mxu1 %v2149_v40  ;;  %v155_v11 = vld [vmem:[#allocation9 + $0x138] sm:$0xff]  ;;  %v3314_v12 = vld [vmem:[#allocation3 + $0x18] sm:$0xff]  ;;  %v2165_v14 = vpack.c.bf16 %v146_v8, %v142_v7  ;;  %v150_v17 = vld [vmem:[#allocation9 + $0x110] sm:$0xff] }
  0x8f   :  { %2212 = vmatprep.subr.bf16.mxu0 %v3286_v34  ;;  %2152 = vmatprep.subr.bf16.mxu1 %v2151_v42  ;;  %v2167_v16 = vpack.c.bf16 %v155_v11, %v151_v10  ;;  %v154_v18 = vld [vmem:[#allocation9 + $0x130] sm:$0xff]  ;;  %v159_v19 = vld [vmem:[#allocation9 + $0x158] sm:$0xff]  ;;  %v3332_v43 = vld [vmem:[#allocation3 + $0x30] sm:$0xff] }
  0x90   :  { %2214 = vmatpush1.bf16.msra.mxu0 %v3289_v41  ;;  %v163_v21 = vld [vmem:[#allocation9 + $0x178] sm:$0xff]  ;;  %v3320_v23 = vld [vmem:[#allocation3 + $0x20] sm:$0xff]  ;;  %v2169_v24 = vpack.c.bf16 %v154_v18, %v150_v17  ;;  %v3338_v54 = vld [vmem:[#allocation3 + $0x38] sm:$0xff] }
  0x91   :  { %2248 = vmatprep.subr.bf16.mxu0 %v3245_v9  ;;  %267 = vmatmul.mubr.f32.vlgmr.msra.gmra.mrb[0].mxu1 %v3292_v48  ;;  %v2171_v25 = vpack.c.bf16 %v163_v21, %v159_v19  ;;  %v158_v27 = vld [vmem:[#allocation9 + $0x150] sm:$0xff]  ;;  %v167_v30 = vld [vmem:[#allocation9 + $0x198] sm:$0xff] }
  0x92   :  { %2154 = vmatpush1.bf16.msra.mxu1 %v2153_v49  ;;  %272 = vmatprep.mubr.f32.mxu1 %v3781_v0  ;;  %v162_v28 = vld [vmem:[#allocation9 + $0x170] sm:$0xff]  ;;  %v171_v31 = vld [vmem:[#allocation9 + $0x1b8] sm:$0xff] }
  0x93   :  { %559 = vmatmul.mubr.f32.vlgmr.msra.gmra.mrb[0].mxu0 %v3295_v50  ;;  %2156 = vmatprep.subr.bf16.mxu1 %v2155_v51  ;;  %v3326_v32 = vld [vmem:[#allocation3 + $0x28] sm:$0xff]  ;;  %v2173_v33 = vpack.c.bf16 %v162_v28, %v158_v27  ;;  %v2175_v36 = vpack.c.bf16 %v171_v31, %v167_v30  ;;  %v166_v37 = vld [vmem:[#allocation9 + $0x190] sm:$0xff] }
  0x94   :  { %2250 = vmatpush1.bf16.msra.mxu0 %v3247_v13  ;;  %729 = vmatprep.mubr.f32.mxu0 %v3781_v0  ;;  %v170_v38 = vld [vmem:[#allocation9 + $0x1b0] sm:$0xff]  ;;  %v175_v40 = vld [vmem:[#allocation9 + $0x1d8] sm:$0xff] }
  0x95   :  { %273 = vmatmul.mubr.f32.gmra.mrb[2].mxu1 %v3300_v58  ;;  %2252 = vmatprep.subr.bf16.mxu0 %v3251_v22  ;;  %v179_v42 = vld [vmem:[#allocation9 + $0x1f8] sm:$0xff]  ;;  %v2177_v45 = vpack.c.bf16 %v170_v38, %v166_v37  ;;  %v174_v47 = vld [vmem:[#allocation9 + $0x1d0] sm:$0xff] }
  0x96   :  { %2158 = vmatpush1.bf16.msra.mxu1 %v2157_v59  ;;  %278 = vmatprep.mubr.f32.mxu1 %v3781_v0  ;;  %v2179_v46 = vpack.c.bf16 %v179_v42, %v175_v40  ;;  %v178_v49 = vld [vmem:[#allocation9 + $0x1f0] sm:$0xff]  ;;  %v431_v51 = vld [vmem:[#allocation11 + $0x18] sm:$0xff] }
  0x97   :  { %2160 = vmatprep.subr.bf16.mxu1 %v2159_v60  ;;  %v435_v53 = vld [vmem:[#allocation11 + $0x38] sm:$0xff]  ;;  %v2181_v55 = vpack.c.bf16 %v178_v49, %v174_v47  ;;  %v430_v59 = vld [vmem:[#allocation11 + $0x10] sm:$0xff] }
  0x98   :  { %2254 = vmatpush1.bf16.msra.mxu0 %v3253_v26  ;;  %v3340_v56 = vpack.c.bf16 %v435_v53, %v431_v51  ;;  %v434_v60 = vld [vmem:[#allocation11 + $0x30] sm:$0xff]  ;;  %v439_v61 = vld [vmem:[#allocation11 + $0x58] sm:$0xff] }
  0x99   :  { %279 = vmatmul.mubr.f32.gmra.mrb[4].mxu1 %v3308_v3  ;;  %2256 = vmatprep.subr.bf16.mxu0 %v3256_v35  ;;  %v443_v62 = vld [vmem:[#allocation11 + $0x78] sm:$0xff]  ;;  %v3346_v63 = vpack.c.bf16 %v434_v60, %v430_v59  ;;  %v454_v21 = vld [vmem:[#allocation11 + $0xd0] sm:$0xff] }
  0x9a   :  { %2162 = vmatpush1.bf16.msra.mxu1 %v2161_v4  ;;  %284 = vmatprep.mubr.f32.mxu1 %v3781_v0  ;;  %v3349_v2 = vpack.c.bf16 %v443_v62, %v439_v61  ;;  %v438_v4 = vld [vmem:[#allocation11 + $0x50] sm:$0xff]  ;;  %v447_v7 = vld [vmem:[#allocation11 + $0x98] sm:$0xff] }
  0x9b   :  { %2164 = vmatprep.subr.bf16.mxu1 %v2163_v5  ;;  %v442_v5 = vld [vmem:[#allocation11 + $0x70] sm:$0xff]  ;;  %v451_v8 = vld [vmem:[#allocation11 + $0xb8] sm:$0xff] }
  0x9c   :  { %2258 = vmatpush1.bf16.msra.mxu0 %v3259_v39  ;;  %v3356_v10 = vpack.c.bf16 %v442_v5, %v438_v4  ;;  %v3359_v11 = vpack.c.bf16 %v451_v8, %v447_v7  ;;  %v455_v17 = vld [vmem:[#allocation11 + $0xd8] sm:$0xff]  ;;  %v462_v30 = vld [vmem:[#allocation11 + $0x110] sm:$0xff] }
  0x9d   :  { %285 = vmatmul.mubr.f32.gmra.mrb[6].mxu1 %v3314_v12  ;;  %2260 = vmatprep.subr.bf16.mxu0 %v3262_v44  ;;  %v459_v18 = vld [vmem:[#allocation11 + $0xf8] sm:$0xff]  ;;  %v466_v31 = vld [vmem:[#allocation11 + $0x130] sm:$0xff] }
  0x9e   :  { %2166 = vmatpush1.bf16.msra.mxu1 %v2165_v14  ;;  %290 = vmatprep.mubr.f32.mxu1 %v3781_v0  ;;  %v446_v14 = vld [vmem:[#allocation11 + $0x90] sm:$0xff]  ;;  %v3367_v19 = vpack.c.bf16 %v459_v18, %v455_v17  ;;  %v467_v27 = vld [vmem:[#allocation11 + $0x138] sm:$0xff] }
  0x9f   :  { %2168 = vmatprep.subr.bf16.mxu1 %v2167_v16  ;;  %v450_v16 = vld [vmem:[#allocation11 + $0xb0] sm:$0xff]  ;;  %v479_v42 = vld [vmem:[#allocation11 + $0x198] sm:$0xff] }
  0xa0   :  { %2262 = vmatpush1.bf16.msra.mxu0 %v3265_v52  ;;  %v470_v38 = vld [vmem:[#allocation11 + $0x150] sm:$0xff]  ;;  %v487_v51 = vld [vmem:[#allocation11 + $0x1d8] sm:$0xff] }
  0xa1   :  { %291 = vmatmul.mubr.f32.gmra.mrb[8].mxu1 %v3320_v23  ;;  %2264 = vmatprep.subr.bf16.mxu0 %v3268_v57  ;;  %v474_v40 = vld [vmem:[#allocation11 + $0x170] sm:$0xff]  ;;  %v491_v53 = vld [vmem:[#allocation11 + $0x1f8] sm:$0xff] }
  0xa2   :  { %2170 = vmatpush1.bf16.msra.mxu1 %v2169_v24  ;;  %296 = vmatprep.mubr.f32.mxu1 %v3781_v0  ;;  %v458_v24 = vld [vmem:[#allocation11 + $0xf0] sm:$0xff] }
  0xa3   :  { %2172 = vmatprep.subr.bf16.mxu1 %v2171_v25  ;;  %v463_v25 = vld [vmem:[#allocation11 + $0x118] sm:$0xff]  ;;  %v478_v47 = vld [vmem:[#allocation11 + $0x190] sm:$0xff] }
  0xa4   :  { %2266 = vmatpush1.bf16.msra.mxu0 %v3271_v1  ;;  %v3375_v28 = vpack.c.bf16 %v467_v27, %v463_v25  ;;  %v482_v49 = vld [vmem:[#allocation11 + $0x1b0] sm:$0xff] }
  0xa5   :  { %297 = vmatmul.mubr.f32.gmra.mrb[10].mxu1 %v3326_v32  ;;  %2268 = vmatprep.subr.bf16.mxu0 %v3274_v6  ;;  %v486_v59 = vld [vmem:[#allocation11 + $0x1d0] sm:$0xff] }
  0xa6   :  { %2174 = vmatpush1.bf16.msra.mxu1 %v2173_v33  ;;  %302 = vmatprep.mubr.f32.mxu1 %v3781_v0  ;;  %v471_v33 = vld [vmem:[#allocation11 + $0x158] sm:$0xff]  ;;  %v490_v60 = vld [vmem:[#allocation11 + $0x1f0] sm:$0xff] }
  0xa7   :  { %2176 = vmatprep.subr.bf16.mxu1 %v2175_v36  ;;  %v475_v36 = vld [vmem:[#allocation11 + $0x178] sm:$0xff]  ;;  %v3404_v61 = vpack.c.bf16 %v490_v60, %v486_v59 }
  0xa8   :  { %2270 = vmatpush1.bf16.msra.mxu0 %v3277_v15  ;;  %v3383_v37 = vpack.c.bf16 %v475_v36, %v471_v33 }
  0xa9   :  { %303 = vmatmul.mubr.f32.gmra.mrb[12].mxu1 %v3332_v43  ;;  %2272 = vmatprep.subr.bf16.mxu0 %v3280_v20 }
  0xaa   :  { %2178 = vmatpush1.bf16.msra.mxu1 %v2177_v45  ;;  %308 = vmatprep.mubr.f32.mxu1 %v3781_v0  ;;  %v483_v45 = vld [vmem:[#allocation11 + $0x1b8] sm:$0xff] }
  0xab   :  { %2180 = vmatprep.subr.bf16.mxu1 %v2179_v46  ;;  %v3391_v46 = vpack.c.bf16 %v483_v45, %v479_v42 }
  0xac   :  { %2274 = vmatpush1.bf16.msra.mxu0 %v3283_v29 }
  0xad   :  { %309 = vmatmul.mubr.f32.gmra.mrb[14].mxu1 %v3338_v54  ;;  %2276 = vmatprep.subr.bf16.mxu0 %v3286_v34 }
  0xae   :  { %2182 = vmatpush1.bf16.msra.mxu1 %v2181_v55  ;;  %379 = vmatprep.mubr.f32.mxu1 %v3781_v0  ;;  %v3399_v55 = vpack.c.bf16 %v491_v53, %v487_v51 }
  0xaf   :  { %2216 = vmatprep.subr.bf16.mxu1 %v3340_v56 }
  0xb0   :  { %2278 = vmatpush1.bf16.msra.mxu0 %v3289_v41 }
  0xb1   :  { %380 = vmatmul.mubr.f32.vlgmr.msra.gmra.mrb[16].mxu1 %v3292_v48  ;;  %2312 = vmatprep.subr.bf16.mxu0 %v3245_v9  ;;  %v3364_v48 = vpack.c.bf16 %v450_v16, %v446_v14 }
  0xb2   :  { %2218 = vmatpush1.bf16.msra.mxu1 %v3346_v63  ;;  %385 = vmatprep.mubr.f32.mxu1 %v3781_v0 }
  0xb3   :  { %2220 = vmatprep.subr.bf16.mxu1 %v3349_v2 }
  0xb5   :  { %386 = vmatmul.mubr.f32.gmra.mrb[18].mxu1 %v3300_v58  ;;  %v3372_v58 = vpack.c.bf16 %v458_v24, %v454_v21 }
  0xb6   :  { %2222 = vmatpush1.bf16.msra.mxu1 %v3356_v10  ;;  %391 = vmatprep.mubr.f32.mxu1 %v3781_v0 }
  0xb7   :  { %2224 = vmatprep.subr.bf16.mxu1 %v3359_v11 }
  0xb9   :  { %392 = vmatmul.mubr.f32.gmra.mrb[20].mxu1 %v3308_v3  ;;  %v3380_v3 = vpack.c.bf16 %v466_v31, %v462_v30 }
  0xba   :  { %2226 = vmatpush1.bf16.msra.mxu1 %v3364_v48  ;;  %397 = vmatprep.mubr.f32.mxu1 %v3781_v0 }
  0xbb   :  { %2228 = vmatprep.subr.bf16.mxu1 %v3367_v19 }
  0xbd   :  { %398 = vmatmul.mubr.f32.gmra.mrb[22].mxu1 %v3314_v12  ;;  %v3388_v12 = vpack.c.bf16 %v474_v40, %v470_v38 }
  0xbe   :  { %2230 = vmatpush1.bf16.msra.mxu1 %v3372_v58  ;;  %403 = vmatprep.mubr.f32.mxu1 %v3781_v0 }
  0xbf   :  { %2232 = vmatprep.subr.bf16.mxu1 %v3375_v28 }
  0xc1   :  { %404 = vmatmul.mubr.f32.gmra.mrb[24].mxu1 %v3320_v23  ;;  %v3396_v23 = vpack.c.bf16 %v482_v49, %v478_v47 }
  0xc2   :  { %2234 = vmatpush1.bf16.msra.mxu1 %v3380_v3  ;;  %409 = vmatprep.mubr.f32.mxu1 %v3781_v0 }
  0xc3   :  { %2236 = vmatprep.subr.bf16.mxu1 %v3383_v37 }
  0xc5   :  { %410 = vmatmul.mubr.f32.gmra.mrb[26].mxu1 %v3326_v32 }
  0xc6   :  { %2238 = vmatpush1.bf16.msra.mxu1 %v3388_v12  ;;  %415 = vmatprep.mubr.f32.mxu1 %v3781_v0 }
  0xc7   :  { %2240 = vmatprep.subr.bf16.mxu1 %v3391_v46 }
  0xc9   :  { %416 = vmatmul.mubr.f32.gmra.mrb[28].mxu1 %v3332_v43 }
  0xca   :  { %2242 = vmatpush1.bf16.msra.mxu1 %v3396_v23  ;;  %421 = vmatprep.mubr.f32.mxu1 %v3781_v0 }
  0xcb   :  { %2244 = vmatprep.subr.bf16.mxu1 %v3399_v55 }
  0xcd   :  { %422 = vmatmul.mubr.f32.gmra.mrb[30].mxu1 %v3338_v54  ;;  %v180_v54 = vld [vmem:[%s3777_s5] sm:$0xf] }
  0xce   :  { %2246 = vmatpush1.bf16.msra.mxu1 %v3404_v61  ;;  %629 = vmatprep.mubr.f32.mxu1 %v3781_v0 }
  0xcf   :  { %2280 = vmatprep.subr.bf16.mxu1 %v3340_v56 }
  0xd1   :  { %630 = vmatmul.mubr.f32.vlgmr.msra.gmra.mrb[16].mxu1 %v3295_v50  ;;  %v182_v50 = vlaneseq }
  0xd2   :  { %2282 = vmatpush1.bf16.msra.mxu1 %v3346_v63  ;;  %800 = vmatprep.mubr.f32.mxu1 %v3781_v0 }
  0xd3   :  { %2284 = vmatprep.subr.bf16.mxu1 %v3349_v2  ;;  %v183_v32 = vshrl.u32 %v182_v50, 7 }
  0xd5   :  { %v184_v43 = vsub.s32 0, %v183_v32  ;;  %v188_v62 = vsub.s32 1, %v183_v32 }
  0xd6   :  { %2286 = vmatpush1.bf16.msra.mxu1 %v3356_v10 }
  0xd7   :  { %2288 = vmatprep.subr.bf16.mxu1 %v3359_v11  ;;  %v185_v4 = vrot.slane %v180_v54, %v184_v43  ;;  %v189_v5 = vrot.slane %v180_v54, %v188_v62 }
  0xda   :  { %2290 = vmatpush1.bf16.msra.mxu1 %v3364_v48 }
  0xdb   :  { %2292 = vmatprep.subr.bf16.mxu1 %v3367_v19 }
  0xde   :  { %2294 = vmatpush1.bf16.msra.mxu1 %v3372_v58 }
  0xdf   :  { %2296 = vmatprep.subr.bf16.mxu1 %v3375_v28 }
  0xe2   :  { %2298 = vmatpush1.bf16.msra.mxu1 %v3380_v3 }
  0xe3   :  { %2300 = vmatprep.subr.bf16.mxu1 %v3383_v37 }
  0xe6   :  { %2302 = vmatpush1.bf16.msra.mxu1 %v3388_v12 }
  0xe7   :  { %2304 = vmatprep.subr.bf16.mxu1 %v3391_v46 }
  0xea   :  { %2306 = vmatpush1.bf16.msra.mxu1 %v3396_v23 }
  0xeb   :  { %2308 = vmatprep.subr.bf16.mxu1 %v3399_v55 }
  0xee   :  { %2310 = vmatpush1.bf16.msra.mxu1 %v3404_v61 }
  0xef   :  { %2344 = vmatprep.subr.bf16.mxu1 %v3340_v56 }
 0x164   :  { %v268_v7 = vpop.f32.mrb[0].mxu1 }
 0x165   :  { %v269_v8 = vadd.f32 %v268_v7, %v185_v4  ;;  %v270_v14 = vpop.f32.mrb[1].mxu1 }
 0x166   :  { %v560_v16 = vpop.f32.mrb[0].mxu0  ;;  %v271_v17 = vadd.f32 %v270_v14, %v189_v5 }
 0x167   :  { %v562_v18 = vpop.f32.mrb[1].mxu0  ;;  %v636_v21 = vadd.f32 %v560_v16, %v269_v8 }
 0x168   :  { %v637_v24 = vadd.f32 %v562_v18, %v271_v17  ;;  %v274_v25 = vpop.f32.mrb[2].mxu1 }
 0x169   :  { %v3432_v27 = vadd.f32 %v274_v25, %v185_v4  ;;  %v276_v30 = vpop.f32.mrb[3].mxu1 }
 0x16a   :  { %v3434_v31 = vadd.f32 %v276_v30, %v189_v5 }
 0x16c   :  { %v280_v33 = vpop.f32.mrb[4].mxu1 }
 0x16d   :  { %v3436_v36 = vadd.f32 %v280_v33, %v185_v4  ;;  %v282_v38 = vpop.f32.mrb[5].mxu1 }
 0x16e   :  { %v3438_v40 = vadd.f32 %v282_v38, %v189_v5  ;;  %v2027_v38 = vmul.f32 -1.442695, %v637_v24 }
 0x170   :  { %v286_v42 = vpop.f32.mrb[6].mxu1  ;;  %2803 = vpow2.f32 %v2027_v38 }
 0x171   :  { %v3440_v45 = vadd.f32 %v286_v42, %v185_v4  ;;  %v288_v47 = vpop.f32.mrb[7].mxu1  ;;  %v2026_v42 = vmul.f32 -1.442695, %v636_v21 }
 0x172   :  { %v3442_v49 = vadd.f32 %v288_v47, %v189_v5  ;;  %v192_v47 = vsub.s32 2, %v183_v32 }
 0x173   :  { %2805 = vpow2.f32 %v2026_v42 }
 0x174   :  { %v292_v51 = vpop.f32.mrb[8].mxu1 }
 0x175   :  { %v3444_v53 = vadd.f32 %v292_v51, %v185_v4  ;;  %v294_v59 = vpop.f32.mrb[9].mxu1 }
 0x176   :  { %v3446_v60 = vadd.f32 %v294_v59, %v189_v5  ;;  %v196_v59 = vsub.s32 3, %v183_v32  ;;  %v493_v32 = vld [vmem:[#allocation8] sm:$0xff] }
 0x178   :  { %v298_v50 = vpop.f32.mrb[10].mxu1 }
 0x179   :  { %v3448_v43 = vadd.f32 %v298_v50, %v185_v4  ;;  %v300_v62 = vpop.f32.mrb[11].mxu1 }
 0x17a   :  { %v3450_v7 = vadd.f32 %v300_v62, %v189_v5  ;;  %v2804_v51 = vpop.eup %2803 }
 0x17b   :  { %v649_v62 = vadd.f32 1.0, %v2804_v51 }
 0x17c   :  { %v304_v8 = vpop.f32.mrb[12].mxu1 }
 0x17d   :  { %v3452_v14 = vadd.f32 %v304_v8, %v185_v4  ;;  %v306_v16 = vpop.f32.mrb[13].mxu1  ;;  %v2806_v50 = vpop.eup %2805  ;;  %v3460_v8 = vrot.slane %v180_v54, %v192_v47  ;;  %2807 = vrcp.f32 %v649_v62  ;;  %v3785_v62 = vmov 0.0  }
 0x17e   :  { %v3454_v17 = vadd.f32 %v306_v16, %v189_v5  ;;  %v643_v0 = vadd.f32 1.0, %v2806_v50  ;;  %v3462_v16 = vrot.slane %v180_v54, %v196_v59 }
 0x180   :  { %3783 = vst [vmem:[#allocation20_spill] sm:$0xff] %v3454_v17  ;;  %v310_v18 = vpop.f32.mrb[14].mxu1  ;;  %2809 = vrcp.f32 %v643_v0 }
 0x181   :  { %v3456_v25 = vadd.f32 %v310_v18, %v185_v4  ;;  %v312_v30 = vpop.f32.mrb[15].mxu1 }
 0x182   :  { %v3458_v33 = vadd.f32 %v312_v30, %v189_v5 }
 0x184   :  { %3784 = vst [vmem:[#allocation21_spill] sm:$0xff] %v3458_v33 }
 0x187   :  { %v2808_v18 = vpop.eup %2807 }
 0x188   :  { %v659_v42 = vmul.f32 %v2808_v18, %v493_v32 }
 0x18a   :  { %v2810_v30 = vpop.eup %2809 }
 0x1a4   :  { %v631_v17 = vpop.f32.mrb[16].mxu1 }
 0x1a5   :  { %v2759_v4 = vadd.f32 %v631_v17, %v3460_v8  ;;  %v633_v5 = vpop.f32.mrb[17].mxu1 }
 0x1a6   :  { %v2760_v21 = vadd.f32 %v633_v5, %v3462_v16 }
 0x1a7   :  { %2811 = vtanh.f32 %v2759_v4 }
 0x1a8   :  { %v2028_v24 = vmul.f32 -1.442695, %v2760_v21 }
 0x1aa   :  { %2813 = vpow2.f32 %v2028_v24 }
 0x1b1   :  { %v2812_v38 = vpop.eup %2811 }
 0x1b2   :  { %v660_v47 = vmul.f32 %v2812_v38, %v2810_v30 }
 0x1b4   :  { %v2814_v51 = vpop.eup %2813  ;;  %v3466_v54 = vadd.f32 %v660_v47, %v659_v42 }
 0x1b5   :  { %v656_v59 = vadd.f32 1.0, %v2814_v51 }
 0x1b6   :  { %2815 = vtanh.f32 %v3466_v54 }
 0x1b7   :  { %2817 = vrcp.f32 %v656_v59 }
 0x1c0   :  { %v2816_v17 = vpop.eup %2815 }
 0x1c1   :  { %v2818_v0 = vpop.eup %2817 }
 0x1c2   :  { %v3469_v50 = vmul.f32 %v2818_v0, %v2816_v17 }
 0x1c4   :  { %730 = vmatmul.mubr.f32.vlgmr.msra.gmra.mrb[2].mxu0 %v3469_v50  ;;  %801 = vmatmul.mubr.f32.vlgmr.msra.gmra.mrb[18].mxu1 %v3469_v50 }
 0x1c5   :  { %2314 = vmatpush1.bf16.msra.mxu0 %v3247_v13  ;;  %2346 = vmatpush1.bf16.msra.mxu1 %v3346_v63 }
 0x1c6   :  { %2316 = vmatprep.subr.bf16.mxu0 %v3251_v22  ;;  %2348 = vmatprep.subr.bf16.mxu1 %v3349_v2 }
 0x1c7   :  { %900 = vmatprep.mubr.f32.mxu0 %v3785_v62  ;;  %971 = vmatprep.mubr.f32.mxu1 %v3785_v62 }
 0x1c9   :  { %2318 = vmatpush1.bf16.msra.mxu0 %v3253_v26  ;;  %2350 = vmatpush1.bf16.msra.mxu1 %v3356_v10 }
 0x1ca   :  { %2320 = vmatprep.subr.bf16.mxu0 %v3256_v35  ;;  %2352 = vmatprep.subr.bf16.mxu1 %v3359_v11 }
 0x1cd   :  { %2322 = vmatpush1.bf16.msra.mxu0 %v3259_v39  ;;  %2354 = vmatpush1.bf16.msra.mxu1 %v3364_v48 }
 0x1ce   :  { %2324 = vmatprep.subr.bf16.mxu0 %v3262_v44  ;;  %2356 = vmatprep.subr.bf16.mxu1 %v3367_v19 }
 0x1d1   :  { %2326 = vmatpush1.bf16.msra.mxu0 %v3265_v52  ;;  %2358 = vmatpush1.bf16.msra.mxu1 %v3372_v58 }
 0x1d2   :  { %2328 = vmatprep.subr.bf16.mxu0 %v3268_v57  ;;  %2360 = vmatprep.subr.bf16.mxu1 %v3375_v28 }
 0x1d5   :  { %2330 = vmatpush1.bf16.msra.mxu0 %v3271_v1  ;;  %2362 = vmatpush1.bf16.msra.mxu1 %v3380_v3 }
 0x1d6   :  { %2332 = vmatprep.subr.bf16.mxu0 %v3274_v6  ;;  %2364 = vmatprep.subr.bf16.mxu1 %v3383_v37 }
 0x1d9   :  { %2334 = vmatpush1.bf16.msra.mxu0 %v3277_v15  ;;  %2366 = vmatpush1.bf16.msra.mxu1 %v3388_v12 }
 0x1da   :  { %2336 = vmatprep.subr.bf16.mxu0 %v3280_v20  ;;  %2368 = vmatprep.subr.bf16.mxu1 %v3391_v46 }
 0x1dd   :  { %2338 = vmatpush1.bf16.msra.mxu0 %v3283_v29  ;;  %2370 = vmatpush1.bf16.msra.mxu1 %v3396_v23 }
 0x1de   :  { %2340 = vmatprep.subr.bf16.mxu0 %v3286_v34  ;;  %2372 = vmatprep.subr.bf16.mxu1 %v3399_v55 }
 0x1e1   :  { %2342 = vmatpush1.bf16.msra.mxu0 %v3289_v41  ;;  %2374 = vmatpush1.bf16.msra.mxu1 %v3404_v61 }
 0x1e2   :  { %2376 = vmatprep.subr.bf16.mxu0 %v3245_v9  ;;  %2408 = vmatprep.subr.bf16.mxu1 %v3340_v56 }
 0x297   :  { %v731_v4 = vpop.f32.mrb[2].mxu0  ;;  %v802_v5 = vpop.f32.mrb[18].mxu1 }
 0x298   :  { %v807_v21 = vadd.f32 %v731_v4, %v3432_v27  ;;  %v733_v24 = vpop.f32.mrb[3].mxu0  ;;  %v804_v18 = vpop.f32.mrb[19].mxu1  ;;  %v2761_v51 = vadd.f32 %v802_v5, %v3460_v8 }
 0x299   :  { %v808_v32 = vadd.f32 %v733_v24, %v3434_v31  ;;  %v2762_v42 = vadd.f32 %v804_v18, %v3462_v16 }
 0x29a   :  { %v2029_v30 = vmul.f32 -1.442695, %v807_v21 }
 0x29b   :  { %v2030_v38 = vmul.f32 -1.442695, %v808_v32  ;;  %v2031_v47 = vmul.f32 -1.442695, %v2762_v42 }
 0x29c   :  { %2819 = vpow2.f32 %v2029_v30 }
 0x29d   :  { %2821 = vpow2.f32 %v2030_v38 }
 0x29e   :  { %2823 = vpow2.f32 %v2031_v47 }
 0x29f   :  { %2825 = vtanh.f32 %v2761_v51 }
 0x2a6   :  { %v2820_v59 = vpop.eup %2819 }
 0x2a7   :  { %v2822_v17 = vpop.eup %2821  ;;  %v814_v0 = vadd.f32 1.0, %v2820_v59 }
 0x2a8   :  { %v820_v33 = vadd.f32 1.0, %v2822_v17  ;;  %v2824_v27 = vpop.eup %2823 }
 0x2a9   :  { %2827 = vrcp.f32 %v814_v0  ;;  %v2826_v4 = vpop.eup %2825  ;;  %v827_v32 = vadd.f32 1.0, %v2824_v27 }
 0x2aa   :  { %2829 = vrcp.f32 %v820_v33 }
 0x2ab   :  { %2831 = vrcp.f32 %v827_v32 }
 0x2b3   :  { %v2828_v31 = vpop.eup %2827 }
 0x2b4   :  { %v2830_v21 = vpop.eup %2829  ;;  %v831_v24 = vmul.f32 %v2828_v31, %v2826_v4 }
 0x2b5   :  { %v830_v30 = vmul.f32 %v2830_v21, %v3466_v54  ;;  %v2832_v5 = vpop.eup %2831 }
 0x2b7   :  { %v3512_v18 = vadd.f32 %v831_v24, %v830_v30 }
 0x2b9   :  { %2833 = vtanh.f32 %v3512_v18 }
 0x2c3   :  { %v2834_v38 = vpop.eup %2833 }
 0x2c4   :  { %v3515_v42 = vmul.f32 %v2834_v38, %v2832_v5 }
 0x2c6   :  { %901 = vmatmul.mubr.f32.vlgmr.msra.gmra.mrb[4].mxu0 %v3515_v42  ;;  %972 = vmatmul.mubr.f32.vlgmr.msra.gmra.mrb[20].mxu1 %v3515_v42 }
 0x2c7   :  { %2378 = vmatpush1.bf16.msra.mxu0 %v3247_v13  ;;  %2410 = vmatpush1.bf16.msra.mxu1 %v3346_v63 }
 0x2c8   :  { %2380 = vmatprep.subr.bf16.mxu0 %v3251_v22  ;;  %2412 = vmatprep.subr.bf16.mxu1 %v3349_v2 }
 0x2c9   :  { %1071 = vmatprep.mubr.f32.mxu0 %v3785_v62  ;;  %1142 = vmatprep.mubr.f32.mxu1 %v3785_v62 }
 0x2cb   :  { %2382 = vmatpush1.bf16.msra.mxu0 %v3253_v26  ;;  %2414 = vmatpush1.bf16.msra.mxu1 %v3356_v10 }
 0x2cc   :  { %2384 = vmatprep.subr.bf16.mxu0 %v3256_v35  ;;  %2416 = vmatprep.subr.bf16.mxu1 %v3359_v11 }
 0x2cf   :  { %2386 = vmatpush1.bf16.msra.mxu0 %v3259_v39  ;;  %2418 = vmatpush1.bf16.msra.mxu1 %v3364_v48 }
 0x2d0   :  { %2388 = vmatprep.subr.bf16.mxu0 %v3262_v44  ;;  %2420 = vmatprep.subr.bf16.mxu1 %v3367_v19 }
 0x2d3   :  { %2390 = vmatpush1.bf16.msra.mxu0 %v3265_v52  ;;  %2422 = vmatpush1.bf16.msra.mxu1 %v3372_v58 }
 0x2d4   :  { %2392 = vmatprep.subr.bf16.mxu0 %v3268_v57  ;;  %2424 = vmatprep.subr.bf16.mxu1 %v3375_v28 }
 0x2d7   :  { %2394 = vmatpush1.bf16.msra.mxu0 %v3271_v1  ;;  %2426 = vmatpush1.bf16.msra.mxu1 %v3380_v3 }
 0x2d8   :  { %2396 = vmatprep.subr.bf16.mxu0 %v3274_v6  ;;  %2428 = vmatprep.subr.bf16.mxu1 %v3383_v37 }
 0x2db   :  { %2398 = vmatpush1.bf16.msra.mxu0 %v3277_v15  ;;  %2430 = vmatpush1.bf16.msra.mxu1 %v3388_v12 }
 0x2dc   :  { %2400 = vmatprep.subr.bf16.mxu0 %v3280_v20  ;;  %2432 = vmatprep.subr.bf16.mxu1 %v3391_v46 }
 0x2df   :  { %2402 = vmatpush1.bf16.msra.mxu0 %v3283_v29  ;;  %2434 = vmatpush1.bf16.msra.mxu1 %v3396_v23 }
 0x2e0   :  { %2404 = vmatprep.subr.bf16.mxu0 %v3286_v34  ;;  %2436 = vmatprep.subr.bf16.mxu1 %v3399_v55 }
 0x2e3   :  { %2406 = vmatpush1.bf16.msra.mxu0 %v3289_v41  ;;  %2438 = vmatpush1.bf16.msra.mxu1 %v3404_v61 }
 0x2e4   :  { %2440 = vmatprep.subr.bf16.mxu0 %v3245_v9  ;;  %2472 = vmatprep.subr.bf16.mxu1 %v3340_v56 }
 0x399   :  { %v902_v33 = vpop.f32.mrb[4].mxu0  ;;  %v973_v54 = vpop.f32.mrb[20].mxu1 }
 0x39a   :  { %v978_v47 = vadd.f32 %v902_v33, %v3436_v36  ;;  %v904_v51 = vpop.f32.mrb[5].mxu0  ;;  %v975_v59 = vpop.f32.mrb[21].mxu1  ;;  %v2763_v21 = vadd.f32 %v973_v54, %v3460_v8 }
 0x39b   :  { %v979_v17 = vadd.f32 %v904_v51, %v3438_v40  ;;  %v2764_v4 = vadd.f32 %v975_v59, %v3462_v16 }
 0x39c   :  { %v2032_v0 = vmul.f32 -1.442695, %v978_v47 }
 0x39d   :  { %v2033_v27 = vmul.f32 -1.442695, %v979_v17  ;;  %v2034_v31 = vmul.f32 -1.442695, %v2764_v4 }
 0x39e   :  { %2835 = vpow2.f32 %v2032_v0 }
 0x39f   :  { %2837 = vpow2.f32 %v2033_v27 }
 0x3a0   :  { %2839 = vpow2.f32 %v2034_v31 }
 0x3a1   :  { %2841 = vtanh.f32 %v2763_v21 }
 0x3a8   :  { %v2836_v24 = vpop.eup %2835 }
 0x3a9   :  { %v2838_v32 = vpop.eup %2837  ;;  %v985_v30 = vadd.f32 1.0, %v2836_v24 }
 0x3aa   :  { %v991_v5 = vadd.f32 1.0, %v2838_v32  ;;  %v2840_v36 = vpop.eup %2839 }
 0x3ab   :  { %2843 = vrcp.f32 %v985_v30  ;;  %v2842_v38 = vpop.eup %2841  ;;  %v998_v51 = vadd.f32 1.0, %v2840_v36 }
 0x3ac   :  { %2845 = vrcp.f32 %v991_v5 }
 0x3ad   :  { %2847 = vrcp.f32 %v998_v51 }
 0x3b5   :  { %v2844_v40 = vpop.eup %2843 }
 0x3b6   :  { %v2846_v33 = vpop.eup %2845  ;;  %v1002_v47 = vmul.f32 %v2844_v40, %v2842_v38 }
 0x3b7   :  { %v1001_v17 = vmul.f32 %v2846_v33, %v3512_v18  ;;  %v2848_v54 = vpop.eup %2847 }
 0x3b9   :  { %v3558_v59 = vadd.f32 %v1002_v47, %v1001_v17 }
 0x3bb   :  { %2849 = vtanh.f32 %v3558_v59 }
 0x3c5   :  { %v2850_v0 = vpop.eup %2849 }
 0x3c6   :  { %v3561_v27 = vmul.f32 %v2850_v0, %v2848_v54 }
 0x3c8   :  { %1072 = vmatmul.mubr.f32.vlgmr.msra.gmra.mrb[6].mxu0 %v3561_v27  ;;  %1143 = vmatmul.mubr.f32.vlgmr.msra.gmra.mrb[22].mxu1 %v3561_v27 }
 0x3c9   :  { %2442 = vmatpush1.bf16.msra.mxu0 %v3247_v13  ;;  %2474 = vmatpush1.bf16.msra.mxu1 %v3346_v63 }
 0x3ca   :  { %2444 = vmatprep.subr.bf16.mxu0 %v3251_v22  ;;  %2476 = vmatprep.subr.bf16.mxu1 %v3349_v2 }
 0x3cb   :  { %1242 = vmatprep.mubr.f32.mxu0 %v3785_v62  ;;  %1313 = vmatprep.mubr.f32.mxu1 %v3785_v62 }
 0x3cd   :  { %2446 = vmatpush1.bf16.msra.mxu0 %v3253_v26  ;;  %2478 = vmatpush1.bf16.msra.mxu1 %v3356_v10 }
 0x3ce   :  { %2448 = vmatprep.subr.bf16.mxu0 %v3256_v35  ;;  %2480 = vmatprep.subr.bf16.mxu1 %v3359_v11 }
 0x3d1   :  { %2450 = vmatpush1.bf16.msra.mxu0 %v3259_v39  ;;  %2482 = vmatpush1.bf16.msra.mxu1 %v3364_v48 }
 0x3d2   :  { %2452 = vmatprep.subr.bf16.mxu0 %v3262_v44  ;;  %2484 = vmatprep.subr.bf16.mxu1 %v3367_v19 }
 0x3d5   :  { %2454 = vmatpush1.bf16.msra.mxu0 %v3265_v52  ;;  %2486 = vmatpush1.bf16.msra.mxu1 %v3372_v58 }
 0x3d6   :  { %2456 = vmatprep.subr.bf16.mxu0 %v3268_v57  ;;  %2488 = vmatprep.subr.bf16.mxu1 %v3375_v28 }
 0x3d9   :  { %2458 = vmatpush1.bf16.msra.mxu0 %v3271_v1  ;;  %2490 = vmatpush1.bf16.msra.mxu1 %v3380_v3 }
 0x3da   :  { %2460 = vmatprep.subr.bf16.mxu0 %v3274_v6  ;;  %2492 = vmatprep.subr.bf16.mxu1 %v3383_v37 }
 0x3dd   :  { %2462 = vmatpush1.bf16.msra.mxu0 %v3277_v15  ;;  %2494 = vmatpush1.bf16.msra.mxu1 %v3388_v12 }
 0x3de   :  { %2464 = vmatprep.subr.bf16.mxu0 %v3280_v20  ;;  %2496 = vmatprep.subr.bf16.mxu1 %v3391_v46 }
 0x3e1   :  { %2466 = vmatpush1.bf16.msra.mxu0 %v3283_v29  ;;  %2498 = vmatpush1.bf16.msra.mxu1 %v3396_v23 }
 0x3e2   :  { %2468 = vmatprep.subr.bf16.mxu0 %v3286_v34  ;;  %2500 = vmatprep.subr.bf16.mxu1 %v3399_v55 }
 0x3e5   :  { %2470 = vmatpush1.bf16.msra.mxu0 %v3289_v41  ;;  %2502 = vmatpush1.bf16.msra.mxu1 %v3404_v61 }
 0x3e6   :  { %2504 = vmatprep.subr.bf16.mxu0 %v3245_v9  ;;  %2536 = vmatprep.subr.bf16.mxu1 %v3340_v56 }
 0x49b   :  { %v1073_v18 = vpop.f32.mrb[6].mxu0  ;;  %v1144_v4 = vpop.f32.mrb[22].mxu1 }
 0x49c   :  { %v1149_v31 = vadd.f32 %v1073_v18, %v3440_v45  ;;  %v1075_v21 = vpop.f32.mrb[7].mxu0  ;;  %v1146_v24 = vpop.f32.mrb[23].mxu1  ;;  %v2765_v40 = vadd.f32 %v1144_v4, %v3460_v8 }
 0x49d   :  { %v1150_v32 = vadd.f32 %v1075_v21, %v3442_v49  ;;  %v2766_v36 = vadd.f32 %v1146_v24, %v3462_v16 }
 0x49e   :  { %v2035_v30 = vmul.f32 -1.442695, %v1149_v31 }
 0x49f   :  { %v2036_v5 = vmul.f32 -1.442695, %v1150_v32  ;;  %v2037_v38 = vmul.f32 -1.442695, %v2766_v36 }
 0x4a0   :  { %2851 = vpow2.f32 %v2035_v30 }
 0x4a1   :  { %2853 = vpow2.f32 %v2036_v5 }
 0x4a2   :  { %2855 = vpow2.f32 %v2037_v38 }
 0x4a3   :  { %2857 = vtanh.f32 %v2765_v40 }
 0x4aa   :  { %v2852_v33 = vpop.eup %2851 }
 0x4ab   :  { %v2854_v47 = vpop.eup %2853  ;;  %v1156_v51 = vadd.f32 1.0, %v2852_v33 }
 0x4ac   :  { %v1162_v17 = vadd.f32 1.0, %v2854_v47  ;;  %v2856_v45 = vpop.eup %2855 }
 0x4ad   :  { %2859 = vrcp.f32 %v1156_v51  ;;  %v2858_v54 = vpop.eup %2857  ;;  %v1169_v31 = vadd.f32 1.0, %v2856_v45 }
 0x4ae   :  { %2861 = vrcp.f32 %v1162_v17 }
 0x4af   :  { %2863 = vrcp.f32 %v1169_v31 }
 0x4b7   :  { %v2860_v49 = vpop.eup %2859 }
 0x4b8   :  { %v2862_v0 = vpop.eup %2861  ;;  %v1173_v18 = vmul.f32 %v2860_v49, %v2858_v54 }
 0x4b9   :  { %v1172_v21 = vmul.f32 %v2862_v0, %v3558_v59  ;;  %v2864_v4 = vpop.eup %2863 }
 0x4bb   :  { %v3604_v24 = vadd.f32 %v1173_v18, %v1172_v21 }
 0x4bd   :  { %2865 = vtanh.f32 %v3604_v24 }
 0x4c7   :  { %v2866_v32 = vpop.eup %2865 }
 0x4c8   :  { %v3607_v30 = vmul.f32 %v2866_v32, %v2864_v4 }
 0x4ca   :  { %1243 = vmatmul.mubr.f32.vlgmr.msra.gmra.mrb[8].mxu0 %v3607_v30  ;;  %1314 = vmatmul.mubr.f32.vlgmr.msra.gmra.mrb[24].mxu1 %v3607_v30 }
 0x4cb   :  { %2506 = vmatpush1.bf16.msra.mxu0 %v3247_v13  ;;  %2538 = vmatpush1.bf16.msra.mxu1 %v3346_v63 }
 0x4cc   :  { %2508 = vmatprep.subr.bf16.mxu0 %v3251_v22  ;;  %2540 = vmatprep.subr.bf16.mxu1 %v3349_v2 }
 0x4cd   :  { %1413 = vmatprep.mubr.f32.mxu0 %v3785_v62  ;;  %1484 = vmatprep.mubr.f32.mxu1 %v3785_v62 }
 0x4cf   :  { %2510 = vmatpush1.bf16.msra.mxu0 %v3253_v26  ;;  %2542 = vmatpush1.bf16.msra.mxu1 %v3356_v10 }
 0x4d0   :  { %2512 = vmatprep.subr.bf16.mxu0 %v3256_v35  ;;  %2544 = vmatprep.subr.bf16.mxu1 %v3359_v11 }
 0x4d3   :  { %2514 = vmatpush1.bf16.msra.mxu0 %v3259_v39  ;;  %2546 = vmatpush1.bf16.msra.mxu1 %v3364_v48 }
 0x4d4   :  { %2516 = vmatprep.subr.bf16.mxu0 %v3262_v44  ;;  %2548 = vmatprep.subr.bf16.mxu1 %v3367_v19 }
 0x4d7   :  { %2518 = vmatpush1.bf16.msra.mxu0 %v3265_v52  ;;  %2550 = vmatpush1.bf16.msra.mxu1 %v3372_v58 }
 0x4d8   :  { %2520 = vmatprep.subr.bf16.mxu0 %v3268_v57  ;;  %2552 = vmatprep.subr.bf16.mxu1 %v3375_v28 }
 0x4db   :  { %2522 = vmatpush1.bf16.msra.mxu0 %v3271_v1  ;;  %2554 = vmatpush1.bf16.msra.mxu1 %v3380_v3 }
 0x4dc   :  { %2524 = vmatprep.subr.bf16.mxu0 %v3274_v6  ;;  %2556 = vmatprep.subr.bf16.mxu1 %v3383_v37 }
 0x4df   :  { %2526 = vmatpush1.bf16.msra.mxu0 %v3277_v15  ;;  %2558 = vmatpush1.bf16.msra.mxu1 %v3388_v12 }
 0x4e0   :  { %2528 = vmatprep.subr.bf16.mxu0 %v3280_v20  ;;  %2560 = vmatprep.subr.bf16.mxu1 %v3391_v46 }
 0x4e3   :  { %2530 = vmatpush1.bf16.msra.mxu0 %v3283_v29  ;;  %2562 = vmatpush1.bf16.msra.mxu1 %v3396_v23 }
 0x4e4   :  { %2532 = vmatprep.subr.bf16.mxu0 %v3286_v34  ;;  %2564 = vmatprep.subr.bf16.mxu1 %v3399_v55 }
 0x4e7   :  { %2534 = vmatpush1.bf16.msra.mxu0 %v3289_v41  ;;  %2566 = vmatpush1.bf16.msra.mxu1 %v3404_v61 }
 0x4e8   :  { %2568 = vmatprep.subr.bf16.mxu0 %v3245_v9  ;;  %2600 = vmatprep.subr.bf16.mxu1 %v3340_v56 }
 0x59d   :  { %v1244_v59 = vpop.f32.mrb[8].mxu0  ;;  %v1315_v5 = vpop.f32.mrb[24].mxu1 }
 0x59e   :  { %v1320_v36 = vadd.f32 %v1244_v59, %v3444_v53  ;;  %v1246_v38 = vpop.f32.mrb[9].mxu0  ;;  %v1317_v40 = vpop.f32.mrb[25].mxu1  ;;  %v2767_v54 = vadd.f32 %v1315_v5, %v3460_v8 }
 0x59f   :  { %v1321_v33 = vadd.f32 %v1246_v38, %v3446_v60  ;;  %v2768_v17 = vadd.f32 %v1317_v40, %v3462_v16 }
 0x5a0   :  { %v2038_v47 = vmul.f32 -1.442695, %v1320_v36 }
 0x5a1   :  { %v2039_v51 = vmul.f32 -1.442695, %v1321_v33  ;;  %v2040_v45 = vmul.f32 -1.442695, %v2768_v17 }
 0x5a2   :  { %2867 = vpow2.f32 %v2038_v47 }
 0x5a3   :  { %2869 = vpow2.f32 %v2039_v51 }
 0x5a4   :  { %2871 = vpow2.f32 %v2040_v45 }
 0x5a5   :  { %2873 = vtanh.f32 %v2767_v54 }
 0x5ac   :  { %v2868_v49 = vpop.eup %2867 }
 0x5ad   :  { %v2870_v0 = vpop.eup %2869  ;;  %v1327_v18 = vadd.f32 1.0, %v2868_v49 }
 0x5ae   :  { %v1333_v31 = vadd.f32 1.0, %v2870_v0  ;;  %v2872_v53 = vpop.eup %2871 }
 0x5af   :  { %2875 = vrcp.f32 %v1327_v18  ;;  %v2874_v21 = vpop.eup %2873  ;;  %v1340_v59 = vadd.f32 1.0, %v2872_v53 }
 0x5b0   :  { %2877 = vrcp.f32 %v1333_v31 }
 0x5b1   :  { %2879 = vrcp.f32 %v1340_v59 }
 0x5b9   :  { %v2876_v60 = vpop.eup %2875 }
 0x5ba   :  { %v2878_v4 = vpop.eup %2877  ;;  %v1344_v32 = vmul.f32 %v2876_v60, %v2874_v21 }
 0x5bb   :  { %v1343_v36 = vmul.f32 %v2878_v4, %v3604_v24  ;;  %v2880_v5 = vpop.eup %2879 }
 0x5bd   :  { %v3650_v38 = vadd.f32 %v1344_v32, %v1343_v36 }
 0x5bf   :  { %2881 = vtanh.f32 %v3650_v38 }
 0x5c9   :  { %v2882_v40 = vpop.eup %2881 }
 0x5ca   :  { %v3653_v33 = vmul.f32 %v2882_v40, %v2880_v5 }
 0x5cc   :  { %1414 = vmatmul.mubr.f32.vlgmr.msra.gmra.mrb[10].mxu0 %v3653_v33  ;;  %1485 = vmatmul.mubr.f32.vlgmr.msra.gmra.mrb[26].mxu1 %v3653_v33 }
 0x5cd   :  { %2570 = vmatpush1.bf16.msra.mxu0 %v3247_v13  ;;  %2602 = vmatpush1.bf16.msra.mxu1 %v3346_v63 }
 0x5ce   :  { %2572 = vmatprep.subr.bf16.mxu0 %v3251_v22  ;;  %2604 = vmatprep.subr.bf16.mxu1 %v3349_v2 }
 0x5cf   :  { %1584 = vmatprep.mubr.f32.mxu0 %v3785_v62  ;;  %1655 = vmatprep.mubr.f32.mxu1 %v3785_v62 }
 0x5d1   :  { %2574 = vmatpush1.bf16.msra.mxu0 %v3253_v26  ;;  %2606 = vmatpush1.bf16.msra.mxu1 %v3356_v10 }
 0x5d2   :  { %2576 = vmatprep.subr.bf16.mxu0 %v3256_v35  ;;  %2608 = vmatprep.subr.bf16.mxu1 %v3359_v11 }
 0x5d5   :  { %2578 = vmatpush1.bf16.msra.mxu0 %v3259_v39  ;;  %2610 = vmatpush1.bf16.msra.mxu1 %v3364_v48 }
 0x5d6   :  { %2580 = vmatprep.subr.bf16.mxu0 %v3262_v44  ;;  %2612 = vmatprep.subr.bf16.mxu1 %v3367_v19 }
 0x5d9   :  { %2582 = vmatpush1.bf16.msra.mxu0 %v3265_v52  ;;  %2614 = vmatpush1.bf16.msra.mxu1 %v3372_v58 }
 0x5da   :  { %2584 = vmatprep.subr.bf16.mxu0 %v3268_v57  ;;  %2616 = vmatprep.subr.bf16.mxu1 %v3375_v28 }
 0x5dd   :  { %2586 = vmatpush1.bf16.msra.mxu0 %v3271_v1  ;;  %2618 = vmatpush1.bf16.msra.mxu1 %v3380_v3 }
 0x5de   :  { %2588 = vmatprep.subr.bf16.mxu0 %v3274_v6  ;;  %2620 = vmatprep.subr.bf16.mxu1 %v3383_v37 }
 0x5e1   :  { %2590 = vmatpush1.bf16.msra.mxu0 %v3277_v15  ;;  %2622 = vmatpush1.bf16.msra.mxu1 %v3388_v12 }
 0x5e2   :  { %2592 = vmatprep.subr.bf16.mxu0 %v3280_v20  ;;  %2624 = vmatprep.subr.bf16.mxu1 %v3391_v46 }
 0x5e5   :  { %2594 = vmatpush1.bf16.msra.mxu0 %v3283_v29  ;;  %2626 = vmatpush1.bf16.msra.mxu1 %v3396_v23 }
 0x5e6   :  { %2596 = vmatprep.subr.bf16.mxu0 %v3286_v34  ;;  %2628 = vmatprep.subr.bf16.mxu1 %v3399_v55 }
 0x5e9   :  { %2598 = vmatpush1.bf16.msra.mxu0 %v3289_v41  ;;  %2630 = vmatpush1.bf16.msra.mxu1 %v3404_v61 }
 0x5ea   :  { %2632 = vmatprep.subr.bf16.mxu0 %v3245_v9  ;;  %2664 = vmatprep.subr.bf16.mxu1 %v3340_v56 }
 0x69f   :  { %v1415_v24 = vpop.f32.mrb[10].mxu0  ;;  %v1486_v47 = vpop.f32.mrb[26].mxu1 }
 0x6a0   :  { %v1491_v51 = vadd.f32 %v1415_v24, %v3448_v43  ;;  %v1417_v17 = vpop.f32.mrb[11].mxu0  ;;  %v1488_v45 = vpop.f32.mrb[27].mxu1  ;;  %v2769_v53 = vadd.f32 %v1486_v47, %v3460_v8 }
 0x6a1   :  { %v1492_v54 = vadd.f32 %v1417_v17, %v3450_v7  ;;  %v2770_v18 = vadd.f32 %v1488_v45, %v3462_v16  ;;  %v1874_v17 = vld [vmem:[#allocation12 + $0x20] sm:$0xff]  ;;  %v1875_v45 = vld [vmem:[#allocation12 + $0x28] sm:$0xff] }
 0x6a2   :  { %v2041_v49 = vmul.f32 -1.442695, %v1491_v51 }
 0x6a3   :  { %v2042_v0 = vmul.f32 -1.442695, %v1492_v54  ;;  %v2043_v31 = vmul.f32 -1.442695, %v2770_v18  ;;  %v2703_v54 = vpack.c.bf16 %v1875_v45, %v1874_v17 }
 0x6a4   :  { %2883 = vpow2.f32 %v2041_v49  ;;  %v1876_v49 = vld [vmem:[#allocation12 + $0x30] sm:$0xff] }
 0x6a5   :  { %2885 = vpow2.f32 %v2042_v0  ;;  %v1877_v0 = vld [vmem:[#allocation12 + $0x38] sm:$0xff] }
 0x6a6   :  { %2887 = vpow2.f32 %v2043_v31  ;;  %v2707_v18 = vpack.c.bf16 %v1877_v0, %v1876_v49  ;;  %v1878_v31 = vld [vmem:[#allocation12 + $0x40] sm:$0xff] }
 0x6a7   :  { %2889 = vtanh.f32 %v2769_v53  ;;  %v1879_v53 = vld [vmem:[#allocation12 + $0x48] sm:$0xff] }
 0x6ae   :  { %v2884_v9 = vpop.eup %2883 }
 0x6af   :  { %v2886_v21 = vpop.eup %2885  ;;  %v1498_v56 = vadd.f32 1.0, %v2884_v9  ;;  %v2711_v9 = vpack.c.bf16 %v1879_v53, %v1878_v31 }
 0x6b0   :  { %v1504_v60 = vadd.f32 1.0, %v2886_v21  ;;  %v2888_v43 = vpop.eup %2887  ;;  %v1880_v21 = vld [vmem:[#allocation12 + $0x50] sm:$0xff] }
 0x6b1   :  { %2891 = vrcp.f32 %v1498_v56  ;;  %v2890_v4 = vpop.eup %2889  ;;  %v1511_v36 = vadd.f32 1.0, %v2888_v43  ;;  %v1881_v56 = vld [vmem:[#allocation12 + $0x58] sm:$0xff]  ;;  %v1882_v43 = vld [vmem:[#allocation12 + $0x60] sm:$0xff] }
 0x6b2   :  { %2893 = vrcp.f32 %v1504_v60  ;;  %v2715_v60 = vpack.c.bf16 %v1881_v56, %v1880_v21 }
 0x6b3   :  { %2895 = vrcp.f32 %v1511_v36 }
 0x6bb   :  { %v2892_v7 = vpop.eup %2891 }
 0x6bc   :  { %v2894_v32 = vpop.eup %2893  ;;  %v1515_v59 = vmul.f32 %v2892_v7, %v2890_v4  ;;  %v1883_v4 = vld [vmem:[#allocation12 + $0x68] sm:$0xff]  ;;  %v1884_v7 = vld [vmem:[#allocation12 + $0x70] sm:$0xff] }
 0x6bd   :  { %v1514_v5 = vmul.f32 %v2894_v32, %v3650_v38  ;;  %v2896_v24 = vpop.eup %2895  ;;  %v1885_v32 = vld [vmem:[#allocation12 + $0x78] sm:$0xff] }
 0x6bf   :  { %v3696_v40 = vadd.f32 %v1515_v59, %v1514_v5  ;;  %v2723_v59 = vpack.c.bf16 %v1885_v32, %v1884_v7 }
 0x6c1   :  { %2897 = vtanh.f32 %v3696_v40 }
 0x6cb   :  { %v2898_v47 = vpop.eup %2897 }
 0x6cc   :  { %v3699_v51 = vmul.f32 %v2898_v47, %v2896_v24 }
 0x6ce   :  { %1585 = vmatmul.mubr.f32.vlgmr.msra.gmra.mrb[12].mxu0 %v3699_v51  ;;  %1656 = vmatmul.mubr.f32.vlgmr.msra.gmra.mrb[28].mxu1 %v3699_v51 }
 0x6cf   :  { %2634 = vmatpush1.bf16.msra.mxu0 %v3247_v13  ;;  %2666 = vmatpush1.bf16.msra.mxu1 %v3346_v63  ;;  %v1870_v13 = vld [vmem:[#allocation12] sm:$0xff] }
 0x6d0   :  { %2636 = vmatprep.subr.bf16.mxu0 %v3251_v22  ;;  %2668 = vmatprep.subr.bf16.mxu1 %v3349_v2  ;;  %v1871_v22 = vld [vmem:[#allocation12 + $0x8] sm:$0xff] }
 0x6d1   :  { %1755 = vmatprep.mubr.f32.mxu0 %v3785_v62  ;;  %1826 = vmatprep.mubr.f32.mxu1 %v3785_v62 }
 0x6d3   :  { %2638 = vmatpush1.bf16.msra.mxu0 %v3253_v26  ;;  %2670 = vmatpush1.bf16.msra.mxu1 %v3356_v10  ;;  %v2695_v26 = vpack.c.bf16 %v1871_v22, %v1870_v13  ;;  %v3787_v13 = vld [vmem:[#allocation21_spill] sm:$0xff] }
 0x6d4   :  { %2640 = vmatprep.subr.bf16.mxu0 %v3256_v35  ;;  %2672 = vmatprep.subr.bf16.mxu1 %v3359_v11 }
 0x6d7   :  { %2642 = vmatpush1.bf16.msra.mxu0 %v3259_v39  ;;  %2674 = vmatpush1.bf16.msra.mxu1 %v3364_v48 }
 0x6d8   :  { %2644 = vmatprep.subr.bf16.mxu0 %v3262_v44  ;;  %2676 = vmatprep.subr.bf16.mxu1 %v3367_v19 }
 0x6db   :  { %2646 = vmatpush1.bf16.msra.mxu0 %v3265_v52  ;;  %2678 = vmatpush1.bf16.msra.mxu1 %v3372_v58 }
 0x6dc   :  { %2648 = vmatprep.subr.bf16.mxu0 %v3268_v57  ;;  %2680 = vmatprep.subr.bf16.mxu1 %v3375_v28 }
 0x6df   :  { %2650 = vmatpush1.bf16.msra.mxu0 %v3271_v1  ;;  %2682 = vmatpush1.bf16.msra.mxu1 %v3380_v3  ;;  %v3786_v1 = vld [vmem:[#allocation20_spill] sm:$0xff] }
 0x6e0   :  { %2652 = vmatprep.subr.bf16.mxu0 %v3274_v6  ;;  %2684 = vmatprep.subr.bf16.mxu1 %v3383_v37 }
 0x6e3   :  { %2654 = vmatpush1.bf16.msra.mxu0 %v3277_v15  ;;  %2686 = vmatpush1.bf16.msra.mxu1 %v3388_v12 }
 0x6e4   :  { %2656 = vmatprep.subr.bf16.mxu0 %v3280_v20  ;;  %2688 = vmatprep.subr.bf16.mxu1 %v3391_v46 }
 0x6e7   :  { %2658 = vmatpush1.bf16.msra.mxu0 %v3283_v29  ;;  %2690 = vmatpush1.bf16.msra.mxu1 %v3396_v23  ;;  %v1872_v23 = vld [vmem:[#allocation12 + $0x10] sm:$0xff] }
 0x6e8   :  { %2660 = vmatprep.subr.bf16.mxu0 %v3286_v34  ;;  %2692 = vmatprep.subr.bf16.mxu1 %v3399_v55  ;;  %v1873_v55 = vld [vmem:[#allocation12 + $0x18] sm:$0xff] }
 0x6e9   :  { %v2699_v38 = vpack.c.bf16 %v1873_v55, %v1872_v23 }
 0x6eb   :  { %2662 = vmatpush1.bf16.msra.mxu0 %v3289_v41  ;;  %2694 = vmatpush1.bf16.msra.mxu1 %v3404_v61 }
 0x6ec   :  { %2696 = vmatprep.subr.bf16.mxu0 %v2695_v26 }
 0x7a1   :  { %v1586_v35 = vpop.f32.mrb[12].mxu0  ;;  %v1657_v39 = vpop.f32.mrb[28].mxu1 }
 0x7a2   :  { %v1662_v44 = vadd.f32 %v1586_v35, %v3452_v14  ;;  %v1588_v52 = vpop.f32.mrb[13].mxu0  ;;  %v1659_v57 = vpop.f32.mrb[29].mxu1  ;;  %v2771_v41 = vadd.f32 %v1657_v39, %v3460_v8 }
 0x7a3   :  { %v1663_v6 = vadd.f32 %v1588_v52, %v3786_v1  ;;  %v2772_v29 = vadd.f32 %v1659_v57, %v3462_v16 }
 0x7a4   :  { %v2044_v15 = vmul.f32 -1.442695, %v1662_v44 }
 0x7a5   :  { %v2045_v20 = vmul.f32 -1.442695, %v1663_v6  ;;  %v2046_v34 = vmul.f32 -1.442695, %v2772_v29 }
 0x7a6   :  { %2899 = vpow2.f32 %v2044_v15 }
 0x7a7   :  { %2901 = vpow2.f32 %v2045_v20 }
 0x7a8   :  { %2903 = vpow2.f32 %v2046_v34 }
 0x7a9   :  { %2905 = vtanh.f32 %v2771_v41 }
 0x7b0   :  { %v2900_v63 = vpop.eup %2899 }
 0x7b1   :  { %v2902_v2 = vpop.eup %2901  ;;  %v1669_v10 = vadd.f32 1.0, %v2900_v63 }
 0x7b2   :  { %v1675_v11 = vadd.f32 1.0, %v2902_v2  ;;  %v2904_v48 = vpop.eup %2903 }
 0x7b3   :  { %2907 = vrcp.f32 %v1669_v10  ;;  %v2906_v19 = vpop.eup %2905  ;;  %v1682_v37 = vadd.f32 1.0, %v2904_v48 }
 0x7b4   :  { %2909 = vrcp.f32 %v1675_v11 }
 0x7b5   :  { %2911 = vrcp.f32 %v1682_v37 }
 0x7bd   :  { %v2908_v58 = vpop.eup %2907 }
 0x7be   :  { %v2910_v28 = vpop.eup %2909  ;;  %v1686_v3 = vmul.f32 %v2908_v58, %v2906_v19 }
 0x7bf   :  { %v1685_v12 = vmul.f32 %v2910_v28, %v3696_v40  ;;  %v2912_v61 = vpop.eup %2911 }
 0x7c1   :  { %v3740_v46 = vadd.f32 %v1686_v3, %v1685_v12 }
 0x7c3   :  { %2913 = vtanh.f32 %v3740_v46 }
 0x7cd   :  { %v2914_v14 = vpop.eup %2913 }
 0x7ce   :  { %v1689_v62 = vmul.f32 %v2914_v14, %v2912_v61 }
 0x7d0   :  { %1756 = vmatmul.mubr.f32.vlgmr.msra.gmra.mrb[14].mxu0 %v1689_v62  ;;  %1827 = vmatmul.mubr.f32.vlgmr.msra.gmra.mrb[30].mxu1 %v1689_v62 }
 0x7d1   :  { %2698 = vmatpush3.bf16.msra.mxu0 %v2695_v26  ;;  %2107 = vmatprep.mubr.f32.mxu0 %v3469_v50  ;;  %v2719_v50 = vpack.c.bf16 %v1883_v4, %v1882_v43 }
 0x7d2   :  { %2700 = vmatprep.subr.bf16.mxu0 %v2699_v38 }
 0x7d5   :  { %2702 = vmatpush3.bf16.msra.mxu0 %v2699_v38 }
 0x7d6   :  { %2704 = vmatprep.subr.bf16.mxu0 %v2703_v54 }
 0x7d9   :  { %2706 = vmatpush3.bf16.msra.mxu0 %v2703_v54 }
 0x7da   :  { %2708 = vmatprep.subr.bf16.mxu0 %v2707_v18 }
 0x7dd   :  { %2710 = vmatpush3.bf16.msra.mxu0 %v2707_v18 }
 0x7de   :  { %2712 = vmatprep.subr.bf16.mxu0 %v2711_v9 }
 0x7e1   :  { %2714 = vmatpush3.bf16.msra.mxu0 %v2711_v9 }
 0x7e2   :  { %2716 = vmatprep.subr.bf16.mxu0 %v2715_v60 }
 0x7e5   :  { %2718 = vmatpush3.bf16.msra.mxu0 %v2715_v60 }
 0x7e6   :  { %2720 = vmatprep.subr.bf16.mxu0 %v2719_v50 }
 0x7e9   :  { %2722 = vmatpush3.bf16.msra.mxu0 %v2719_v50 }
 0x7ea   :  { %2724 = vmatprep.subr.bf16.mxu0 %v2723_v59 }
 0x7ed   :  { %2726 = vmatpush3.bf16.msra.mxu0 %v2723_v59 }
 0x7f0   :  { %2108 = vmatmul.mubr.f32.vlgmr.msra.gmra.mrb[16].mxu0 %v3515_v42 }
 0x7f1   :  { %2110 = vmatprep.mubr.f32.mxu0 %v3561_v27 }
 0x7f4   :  { %2111 = vmatmul.mubr.f32.gmra.mrb[18].mxu0 %v3607_v30 }
 0x7f5   :  { %2113 = vmatprep.mubr.f32.mxu0 %v3653_v33 }
 0x7f8   :  { %2114 = vmatmul.mubr.f32.gmra.mrb[20].mxu0 %v3699_v51 }
 0x7f9   :  { %2116 = vmatprep.mubr.f32.mxu0 %v1689_v62 }
 0x8a3   :  { %v1757_v36 = vpop.f32.mrb[14].mxu0  ;;  %v1828_v5 = vpop.f32.mrb[30].mxu1 }
 0x8a4   :  { %v1833_v40 = vadd.f32 %v1757_v36, %v3456_v25  ;;  %v1759_v24 = vpop.f32.mrb[15].mxu0  ;;  %v1830_v47 = vpop.f32.mrb[31].mxu1  ;;  %v2773_v30 = vadd.f32 %v1828_v5, %v3460_v8  ;;  %v2050_v8 = vld [vmem:[%s3779_s7] ss:$0 sm:$0xff]  ;;  %s3106_s7 = smov [#allocation14]  }
 0x8a5   :  { %v1834_v22 = vadd.f32 %v1759_v24, %v3787_v13  ;;  %v2774_v42 = vadd.f32 %v1830_v47, %v3462_v16  ;;  %s2011_s13 = sshll.u32 %s3106_s7, 4  ;;  %s2012_s13 = int_to_ptr.vmem [resolvable:$true] %s2011_s13 }
 0x8a6   :  { %v2047_v26 = vmul.f32 -1.442695, %v1833_v40  ;;  %s3063_s14 = scalar_lea.vmem %s2012_s13, 1024  ;;  %p3068_p7 = scmp.lt.s32.totalorder %s2012_s13, %s2012_s13 }
 0x8a7   :  { %v2048_v35 = vmul.f32 -1.442695, %v1834_v22  ;;  %v2049_v27 = vmul.f32 -1.442695, %v2774_v42  ;;  %p3064_p6 = scmp.ne.s32.totalorder %s2012_s13, %s3063_s14  ;;  %p3069_p8 = scmp.lt.s32.totalorder %s3063_s14, %s3063_s14 }
 0x8a8   :  { %2915 = vpow2.f32 %v2047_v26 }
 0x8a9   :  { %2917 = vpow2.f32 %v2048_v35  ;;  %p3070_p9 = por %p3069_p8, %p3068_p7 }
 0x8aa   :  { %2919 = vpow2.f32 %v2049_v27 }
 0x8ab   :  { %2921 = vtanh.f32 %v2773_v30  ;;  %p3071_p10 = pnand %p3070_p9, %p3064_p6 }
 0x8b2   :  { %v2916_v33 = vpop.eup %2915 }
 0x8b3   :  { %v2918_v51 = vpop.eup %2917  ;;  %v1840_v39 = vadd.f32 1.0, %v2916_v33 }
 0x8b4   :  { %v1846_v44 = vadd.f32 1.0, %v2918_v51  ;;  %v2920_v25 = vpop.eup %2919 }
 0x8b5   :  { %2923 = vrcp.f32 %v1840_v39  ;;  %v2922_v52 = vpop.eup %2921  ;;  %v1853_v15 = vadd.f32 1.0, %v2920_v25 }
 0x8b6   :  { %2925 = vrcp.f32 %v1846_v44 }
 0x8b7   :  { %2927 = vrcp.f32 %v1853_v15 }
 0x8bf   :  { %v2924_v57 = vpop.eup %2923 }
 0x8c0   :  { %v2926_v1 = vpop.eup %2925  ;;  %v1857_v6 = vmul.f32 %v2924_v57, %v2922_v52 }
 0x8c1   :  { %v1856_v20 = vmul.f32 %v2926_v1, %v3740_v46  ;;  %v2928_v37 = vpop.eup %2927 }
 0x8c3   :  { %v2109_v16 = vpop.f32.mrb[16].mxu0  ;;  %v1858_v29 = vadd.f32 %v1857_v6, %v1856_v20 }
 0x8c4   :  { %v1965_v34 = vadd.f32 %v2109_v16, %v2050_v8  ;;  %v1959_v41 = vpop.f32.mrb[17].mxu0 }
 0x8c5   :  { %v1960_v63 = vadd.f32 %v2050_v8, %v1959_v41  ;;  %2929 = vtanh.f32 %v1858_v29 }
 0x8c6   :  { %1999 = vst [vmem:[#allocation14 + $0x8] sm:$0xff] %v1965_v34 }
 0x8c7   :  { %1998 = vst [vmem:[#allocation14] sm:$0xff] %v1960_v63  ;;  %v2112_v2 = vpop.f32.mrb[18].mxu0 }
 0x8c8   :  { %v1975_v10 = vadd.f32 %v2112_v2, %v2050_v8  ;;  %v1969_v11 = vpop.f32.mrb[19].mxu0 }
 0x8c9   :  { %v1970_v48 = vadd.f32 %v2050_v8, %v1969_v11 }
 0x8ca   :  { %2001 = vst [vmem:[#allocation14 + $0x18] sm:$0xff] %v1975_v10 }
 0x8cb   :  { %2000 = vst [vmem:[#allocation14 + $0x10] sm:$0xff] %v1970_v48  ;;  %v2115_v19 = vpop.f32.mrb[20].mxu0 }
 0x8cc   :  { %v1985_v58 = vadd.f32 %v2115_v19, %v2050_v8  ;;  %v1979_v28 = vpop.f32.mrb[21].mxu0 }
 0x8cd   :  { %v1980_v3 = vadd.f32 %v2050_v8, %v1979_v28 }
 0x8ce   :  { %2003 = vst [vmem:[#allocation14 + $0x28] sm:$0xff] %v1985_v58 }
 0x8cf   :  { %v2930_v12 = vpop.eup %2929  ;;  %2002 = vst [vmem:[#allocation14 + $0x20] sm:$0xff] %v1980_v3 }
 0x8d0   :  { %v1860_v46 = vmul.f32 %v2930_v12, %v2928_v37 }
 0x8d2   :  { %2117 = vmatmul.mubr.f32.gmra.mrb[22].mxu0 %v1860_v46 }
 0x9a5   :  { %v2118_v23 = vpop.f32.mrb[22].mxu0 }
 0x9a6   :  { %v1995_v55 = vadd.f32 %v2118_v23, %v2050_v8  ;;  %v1989_v61 = vpop.f32.mrb[23].mxu0 }
 0x9a7   :  { %v1990_v14 = vadd.f32 %v2050_v8, %v1989_v61 }
 0x9a8   :  { %2005 = vst [vmem:[#allocation14 + $0x38] sm:$0xff] %v1995_v55 }
 0x9a9   :  { %2004 = vst [vmem:[#allocation14 + $0x30] sm:$0xff] %v1990_v14 }
 0x9aa   :  { %3074 = shalt.err (!%p3071_p10)
}
 0x9ab   :  { %s3075_s17 = scalar_lea.hbm %s3780_s8, 1024 }
 0x9ac   :  { %p3076_p11 = scmp.ne.s32.totalorder %s3780_s8, %s3075_s17  ;;  %p3079_p12 = scmp.lt.u32.totalorder %s3075_s17, %s3780_s8 }
 0x9ae   :  { %p3081_p13 = pnand %p3079_p12, %p3076_p11 }
 0x9b0   :  { %3084 = shalt.err (!%p3081_p13)
}
 0x9b1   :  { %2017 = dma.vmem_to_hbm [thread:$0]  %s2012_s13, 1024, %s3780_s8, [#allocation5], %s3100_s3, %s3100_s3, %s3101_s30  }
 0x9b2   :  { %3093 = dma.done.wait [#allocation5], 1024  }
 0x9b3   :  { %3094 = vsyncadd [#allocation5], 4294966272 }
 0x9b4   :  { %2021 = vsyncpa [#allocation4], 1 }
 0x9b5   :  { %2022 = vsyncpa [#allocation7], 1 }
 0x9b6   :  { %2023 = vsyncpa [#allocation10], 1 }
 0x9b7   :  { %2024 = vsyncpa [#allocation13], 1 }
 0x9b8   :  { %2025 = vsyncpa [#allocation5], 1 }

</bundles_post_ra>
